<compile_context>
chip_gen: v6e
topology: v6e:2x2x1
jax: 0.10.0
libtpu: 0.0.40
codegen_flags: <defaults>
</compile_context>

<pallas_src>
import math
from functools import partial

import jax
import jax.numpy as jnp
from jax import lax
from jax.experimental import pallas as pl
from jax.experimental.pallas import tpu as pltpu


# ------------------------------ fused kernel -------------------------------- #

def _fused_kernel(embed_in_kernel, B, S, n_heads, window, eps, embed_scale, *refs):
    if embed_in_kernel:
        (x_ids_ref, id_ids_ref, embed_ref, id_embed_ref,
         small_ref, wqkv_ref, w13_ref, w2_ref, head_w_ref, o_ref) = refs
        BS = x_ids_ref.shape[0]
        D = embed_ref.shape[1]
        n_vocab = embed_ref.shape[0]
        n_pos = id_embed_ref.shape[0]
        # One-hot matmul gather (exact: each one-hot row selects a single table row).
        x_oh = (x_ids_ref[...] ==
                lax.broadcasted_iota(jnp.int32, (BS, n_vocab), 1)).astype(jnp.float32)
        p_oh = (id_ids_ref[...] ==
                lax.broadcasted_iota(jnp.int32, (BS, n_pos), 1)).astype(jnp.float32)
        x_emb = jnp.dot(x_oh, embed_ref[...].astype(jnp.float32),
                        preferred_element_type=jnp.float32)
        p_emb = jnp.dot(p_oh, id_embed_ref[...].astype(jnp.float32),
                        preferred_element_type=jnp.float32)
        # embedding_int scales in bf16 and the residual stream starts bf16;
        # reproduce that rounding, then promote to f32 (RMSNorm does .float()).
        e_scale = jnp.asarray(embed_scale, dtype=jnp.bfloat16)
        x = (x_emb.astype(jnp.bfloat16) * e_scale
             + p_emb.astype(jnp.bfloat16) * e_scale).astype(jnp.float32)   # (BS, D)
    else:
        (h_ref, small_ref, wqkv_ref, w13_ref, w2_ref, head_w_ref, o_ref) = refs
        x = h_ref[...].astype(jnp.float32)
        BS, D = x.shape

    L = wqkv_ref.shape[0]
    dh = D // n_heads
    F2 = w13_ref.shape[2]
    v_pad = head_w_ref.shape[1]

    # Sliding-window band mask on the flattened (B*S) token axis; the
    # block-diagonal term keeps batches independent so all batches share one
    # (BS, BS) score matmul per head.
    ii = lax.broadcasted_iota(jnp.int32, (BS, BS), 0)
    jj = lax.broadcasted_iota(jnp.int32, (BS, BS), 1)
    band = jnp.abs(ii - jj) <= window
    same_batch = ii < 0                                  # all-False init
    for b in range(B):                                   # static unroll, B small
        row_in_b = (ii >= b * S) & (ii < (b + 1) * S)
        col_in_b = (jj >= b * S) & (jj < (b + 1) * S)
        same_batch = same_batch | (row_in_b & col_in_b)
    mask = band & same_batch

    def rms(y, w):                                       # y: (BS, D) f32, w: (1, D)
        ms = jnp.mean(y * y, axis=-1, keepdims=True)
        return y * lax.rsqrt(ms + eps) * w

    for l in range(L):                                   # static unroll (L=2)
        base = 5 * l
        attn_norm = small_ref[base + 0:base + 1, :D]
        bqkv      = small_ref[base + 1:base + 2, :3 * D]
        ffn_norm  = small_ref[base + 2:base + 3, :D]
        b13       = small_ref[base + 3:base + 4, :F2]
        b2        = small_ref[base + 4:base + 5, :D]

        # ----- sliding-window multi-head attention ---------------------------
        xn = rms(x, attn_norm)
        qkv = jnp.dot(xn, wqkv_ref[l],
                      preferred_element_type=jnp.float32) + bqkv        # (BS, 3D)
        q = qkv[:, 0:D]                # 1/sqrt(dh) pre-folded into wq/bq
        k = qkv[:, D:2 * D]
        v = qkv[:, 2 * D:3 * D]

        head_outs = []
        for hh in range(n_heads):                         # static unroll (H=4)
            lo = hh * dh
            qh, kh, vh = q[:, lo:lo + dh], k[:, lo:lo + dh], v[:, lo:lo + dh]
            s = lax.dot_general(qh, kh, (((1,), (1,)), ((), ())),
                                preferred_element_type=jnp.float32)     # (BS, BS)
            s = jnp.where(mask, s, jnp.float32(-1e30))
            m = jnp.max(s, axis=-1, keepdims=True)
            p = jnp.exp(s - m)
            p = p / jnp.sum(p, axis=-1, keepdims=True)    # exact softmax denom
            head_outs.append(jnp.dot(p, vh, preferred_element_type=jnp.float32))
        x = x + jnp.concatenate(head_outs, axis=-1)       # residual (BS, D)

        # ----- SwiGLU FFN -----------------------------------------------------
        xn2 = rms(x, ffn_norm)
        h13 = jnp.dot(xn2, w13_ref[l],
                      preferred_element_type=jnp.float32) + b13         # (BS, 2F)
        Fi = F2 // 2
        h1, h3 = h13[:, :Fi], h13[:, Fi:]
        ff = jnp.dot(h1 * jax.nn.sigmoid(h1) * h3, w2_ref[l],
                     preferred_element_type=jnp.float32) + b2
        x = x + ff

    # ----- final RMSNorm + LM head (lane-dense, padded to 128 cols) -----------
    norm_w = small_ref[5 * L + 0:5 * L + 1, :D]
    head_b = small_ref[5 * L + 1:5 * L + 2, :v_pad]
    xn = rms(x, norm_w)
    o_ref[...] = (jnp.dot(xn, head_w_ref[...],
                          preferred_element_type=jnp.float32) + head_b
                  ).astype(o_ref.dtype)


def fused_forward(fp, cfg, B, S, *, x_ids=None, id_ids=None, h=None):
    """Single pallas_call for the whole forward.  Everything resident in VMEM."""
    embed_in_kernel = h is None
    kern = partial(_fused_kernel, embed_in_kernel, B, S, cfg["n_heads"],
                   cfg["attention_window"], 1e-6, math.sqrt(cfg["d_model"]))
    v_pad = fp["head_w"].shape[1]
    if embed_in_kernel:
        args = (x_ids.reshape(B * S, 1).astype(jnp.int32),
                id_ids.reshape(B * S, 1).astype(jnp.int32),
                fp["embed"], fp["id_embed"],
                fp["small"], fp["wqkv"], fp["w13"], fp["w2"], fp["head_w"])
    else:
        args = (h.astype(jnp.float32),
                fp["small"], fp["wqkv"], fp["w13"], fp["w2"], fp["head_w"])
    vmem = pl.BlockSpec(memory_space=pltpu.MemorySpace.VMEM)
    return pl.pallas_call(
        kern,
        out_shape=jax.ShapeDtypeStruct((B * S, v_pad), jnp.float32),
        in_specs=[vmem] * len(args),
        out_specs=vmem,
    )(*args)


# ----------------- small standalone linear (correct_dim branch) ------------- #

def _linear_kernel(x_ref, w_ref, b_ref, o_ref):
    acc = jnp.dot(x_ref[...], w_ref[...], preferred_element_type=jnp.float32)
    o_ref[...] = (acc + b_ref[...]).astype(o_ref.dtype)


def linear(x, w, b):
    vmem = pl.BlockSpec(memory_space=pltpu.MemorySpace.VMEM)
    return pl.pallas_call(
        _linear_kernel,
        out_shape=jax.ShapeDtypeStruct((x.shape[0], w.shape[1]), jnp.float32),
        in_specs=[vmem, vmem, vmem], out_specs=vmem,
    )(x.astype(jnp.float32), w, b)


# ----------------------------- parameter plumbing --------------------------- #

def prepare_params(params, cfg):
    """Fuse QKV / W1|W3, fold 1/sqrt(head_dim) into wq/bq, stack layers, pack all
    1-row params into one lane-dense (5L+2, 128) array, pad the head to 128 cols."""
    d = cfg["d_model"]
    f = cfg["d_ffn"]
    v = cfg["n_output_values"]
    scale = 1.0 / math.sqrt(d // cfg["n_heads"])
    v_pad = ((v + 127) // 128) * 128
    w_small = ((max(3 * d, 2 * f, d, v_pad) + 127) // 128) * 128

    def pad_row(row, width):                   # (1, n) -> (1, width)
        return jnp.pad(row, ((0, 0), (0, width - row.shape[-1])))

    wqkv, w13, w2, small_rows = [], [], [], []
    for lp in params["layers"]:
        wqkv.append(jnp.concatenate(
            [lp["wq"]["w"] * scale, lp["wk"]["w"], lp["wv"]["w"]], axis=1))
        w13.append(jnp.concatenate([lp["w1"]["w"], lp["w3"]["w"]], axis=1))
        w2.append(lp["w2"]["w"])
        small_rows += [
            pad_row(lp["attn_norm"], w_small),
            pad_row(jnp.concatenate([lp["wq"]["b"] * scale, lp["wk"]["b"],
                                     lp["wv"]["b"]], axis=1), w_small),
            pad_row(lp["ffn_norm"], w_small),
            pad_row(jnp.concatenate([lp["w1"]["b"], lp["w3"]["b"]], axis=1), w_small),
            pad_row(lp["w2"]["b"], w_small),
        ]
    small_rows += [pad_row(params["norm"], w_small),
                   pad_row(params["head"]["b"], w_small)]
    return {
        "wqkv": jnp.stack(wqkv),                     # (L, D, 3D), q pre-scaled
        "w13": jnp.stack(w13),                       # (L, D, 2F)
        "w2": jnp.stack(w2),                         # (L, F, D)
        "small": jnp.concatenate(small_rows, axis=0),  # (5L+2, 128) packed rows
        "head_w": jnp.pad(params["head"]["w"], ((0, 0), (0, v_pad - v))),
        "embed": params["embed"],                    # bf16 (n_input_values, D)
        "id_embed": params["id_embed"],              # bf16 (seq_len, D)
    }


def forward(params, fused, x_ids, id_ids, cfg):
    B, S = x_ids.shape
    V = cfg["n_output_values"]
    if cfg["add_id"]:
        logits_p = fused_forward(fused, cfg, B, S, x_ids=x_ids, id_ids=id_ids)
    else:
        # add_id=False branch: embedding + correct_dim outside, transformer fused.
        d_value, d_id = cfg["d_value"], cfg["d_id"]
        x = jnp.take(params["embed"], x_ids, axis=0) * math.sqrt(d_value)
        idv = jnp.take(params["id_embed"], id_ids, axis=0) * math.sqrt(d_id)
        cat = jnp.concatenate([x, idv], axis=-1).astype(jnp.float32)
        h = linear(cat.reshape(B * S, -1),
                   params["correct_dim"]["w"], params["correct_dim"]["b"])
        logits_p = fused_forward(fused, cfg, B, S, h=h)
    return logits_p.reshape(B, S, -1)[..., :V]


def init_params(key, cfg):
    d = cfg["d_model"]
    f = cfg["d_ffn"]
    keys = iter(jax.random.split(key, 128))

    def dense(din, dout):
        w = jax.random.normal(next(keys), (din, dout), jnp.float32) * 0.02
        b = jnp.zeros((1, dout), jnp.float32)
        return {"w": w, "b": b}

    params = {}
    d_value = d if cfg["add_id"] else cfg["d_value"]
    d_id = d if cfg["add_id"] else cfg["d_id"]
    params["embed"] = (jax.random.normal(next(keys), (cfg["n_input_values"], d_value),
                                         jnp.float32) * 0.02).astype(jnp.bfloat16)
    params["id_embed"] = (jax.random.normal(next(keys), (cfg["seq_len"], d_id),
                                            jnp.float32) * 0.02).astype(jnp.bfloat16)
    if not cfg["add_id"]:
        params["correct_dim"] = dense(d_value + d_id, d)

    layers = []
    for _ in range(cfg["n_layers"]):
        layers.append({
            "attn_norm": jnp.ones((1, d), jnp.float32),
            "ffn_norm": jnp.ones((1, d), jnp.float32),
            "wq": dense(d, d), "wk": dense(d, d), "wv": dense(d, d),
            "w1": dense(d, f), "w3": dense(d, f), "w2": dense(f, d),
        })
    params["layers"] = layers
    params["norm"] = jnp.ones((1, d), jnp.float32)
    params["head"] = dense(d, cfg["n_output_values"])
    return params


if __name__ == "__main__":
    cfg = dict(
        d_model=32, n_heads=4, d_ffn=64, n_layers=2, dropout=0.0,
        seq_len=8, n_input_values=16, n_output_values=16,
        add_id=True, d_id=16, d_value=16,
        attention_window=2,   # one-sided sliding window
    )
    key = jax.random.PRNGKey(0)
    pkey, xkey = jax.random.split(key)
    params = init_params(pkey, cfg)
    fused = prepare_params(params, cfg)

    B, S = 2, cfg["seq_len"]
    x_ids = jax.random.randint(xkey, (B, S), 0, cfg["n_input_values"], dtype=jnp.int32)
    id_ids = jnp.broadcast_to(jnp.arange(S, dtype=jnp.int32), (B, S))

    fwd = jax.jit(lambda p, fp, xi, ii: forward(p, fp, xi, ii, cfg))
    logits = fwd(params, fused, x_ids, id_ids)
    jax.block_until_ready(logits)
    assert logits.shape == (B, S, cfg["n_output_values"])
    print("KERNEL_OK")
</pallas_src>

<mosaic_0001>
module attributes {stable_mosaic.version = 11 : i64} {
  func.func @_fused_kernel(%arg0: memref<16x1xi32, #tpu.memory_space<vmem>>, %arg1: memref<16x1xi32, #tpu.memory_space<vmem>>, %arg2: memref<16x32xbf16, #tpu.memory_space<vmem>>, %arg3: memref<8x32xbf16, #tpu.memory_space<vmem>>, %arg4: memref<12x128xf32, #tpu.memory_space<vmem>>, %arg5: memref<2x32x96xf32, #tpu.memory_space<vmem>>, %arg6: memref<2x32x128xf32, #tpu.memory_space<vmem>>, %arg7: memref<2x64x32xf32, #tpu.memory_space<vmem>>, %arg8: memref<32x128xf32, #tpu.memory_space<vmem>>, %arg9: memref<16x128xf32, #tpu.memory_space<vmem>>) attributes {dimension_semantics = [], scalar_prefetch = 0 : i64, scratch_operands = 0 : i64, tpu.core_type = #tpu.core_type<tc>} {
    %c0 = arith.constant 0 : index
    %c0_0 = arith.constant 0 : index
    %0 = vector.load %arg0[%c0, %c0_0] : memref<16x1xi32, #tpu.memory_space<vmem>>, vector<16x1xi32>
    %1 = tpu.iota {dimensions = array<i32: 1>} : vector<16x16xi32>
    %2 = vector.broadcast %0 : vector<16x1xi32> to vector<16x16xi32>
    %3 = arith.cmpi eq, %2, %1 : vector<16x16xi32>
    %4 = arith.extui %3 : vector<16x16xi1> to vector<16x16xi32>
    %5 = arith.sitofp %4 : vector<16x16xi32> to vector<16x16xf32>
    %c0_1 = arith.constant 0 : index
    %c0_2 = arith.constant 0 : index
    %6 = vector.load %arg1[%c0_1, %c0_2] : memref<16x1xi32, #tpu.memory_space<vmem>>, vector<16x1xi32>
    %7 = tpu.iota {dimensions = array<i32: 1>} : vector<16x8xi32>
    %8 = vector.broadcast %6 : vector<16x1xi32> to vector<16x8xi32>
    %9 = arith.cmpi eq, %8, %7 : vector<16x8xi32>
    %10 = arith.extui %9 : vector<16x8xi1> to vector<16x8xi32>
    %11 = arith.sitofp %10 : vector<16x8xi32> to vector<16x8xf32>
    %c0_3 = arith.constant 0 : index
    %c0_4 = arith.constant 0 : index
    %12 = vector.load %arg2[%c0_3, %c0_4] : memref<16x32xbf16, #tpu.memory_space<vmem>>, vector<16x32xbf16>
    %13 = arith.extf %12 : vector<16x32xbf16> to vector<16x32xf32>
    %cst = arith.constant dense<0.000000e+00> : vector<16x32xf32>
    %14 = tpu.matmul %5, %13, %cst {dimension_numbers = #tpu.dot_dimension_numbers<[1], [0], [0], [1], [0, 0, 1, 1], [], []>} : vector<16x16xf32>, vector<16x32xf32>, vector<16x32xf32> -> vector<16x32xf32>
    %c0_5 = arith.constant 0 : index
    %c0_6 = arith.constant 0 : index
    %15 = vector.load %arg3[%c0_5, %c0_6] : memref<8x32xbf16, #tpu.memory_space<vmem>>, vector<8x32xbf16>
    %16 = arith.extf %15 : vector<8x32xbf16> to vector<8x32xf32>
    %cst_7 = arith.constant dense<0.000000e+00> : vector<16x32xf32>
    %17 = tpu.matmul %11, %16, %cst_7 {dimension_numbers = #tpu.dot_dimension_numbers<[1], [0], [0], [1], [0, 0, 1, 1], [], []>} : vector<16x8xf32>, vector<8x32xf32>, vector<16x32xf32> -> vector<16x32xf32>
    %18 = arith.truncf %14 : vector<16x32xf32> to vector<16x32xbf16>
    %cst_8 = arith.constant 5.656250e+00 : bf16
    %19 = vector.broadcast %cst_8 : bf16 to vector<16x32xbf16>
    %20 = arith.mulf %18, %19 : vector<16x32xbf16>
    %21 = arith.truncf %17 : vector<16x32xf32> to vector<16x32xbf16>
    %cst_9 = arith.constant 5.656250e+00 : bf16
    %22 = vector.broadcast %cst_9 : bf16 to vector<16x32xbf16>
    %23 = arith.mulf %21, %22 : vector<16x32xbf16>
    %24 = arith.addf %20, %23 : vector<16x32xbf16>
    %25 = arith.extf %24 : vector<16x32xbf16> to vector<16x32xf32>
    %26 = tpu.iota {dimensions = array<i32: 0>} : vector<16x16xi32>
    %27 = tpu.iota {dimensions = array<i32: 1>} : vector<16x16xi32>
    %28 = arith.subi %26, %27 : vector<16x16xi32>
    %29 = math.absi %28 : vector<16x16xi32>
    %c2_i32 = arith.constant 2 : i32
    %30 = vector.broadcast %c2_i32 : i32 to vector<16x16xi32>
    %31 = arith.cmpi sle, %29, %30 : vector<16x16xi32>
    %c0_i32 = arith.constant 0 : i32
    %32 = vector.broadcast %c0_i32 : i32 to vector<16x16xi32>
    %33 = arith.cmpi slt, %26, %32 : vector<16x16xi32>
    %c0_i32_10 = arith.constant 0 : i32
    %34 = vector.broadcast %c0_i32_10 : i32 to vector<16x16xi32>
    %35 = arith.cmpi sge, %26, %34 : vector<16x16xi32>
    %c8_i32 = arith.constant 8 : i32
    %36 = vector.broadcast %c8_i32 : i32 to vector<16x16xi32>
    %37 = arith.cmpi slt, %26, %36 : vector<16x16xi32>
    %38 = arith.andi %35, %37 : vector<16x16xi1>
    %c0_i32_11 = arith.constant 0 : i32
    %39 = vector.broadcast %c0_i32_11 : i32 to vector<16x16xi32>
    %40 = arith.cmpi sge, %27, %39 : vector<16x16xi32>
    %c8_i32_12 = arith.constant 8 : i32
    %41 = vector.broadcast %c8_i32_12 : i32 to vector<16x16xi32>
    %42 = arith.cmpi slt, %27, %41 : vector<16x16xi32>
    %43 = arith.andi %40, %42 : vector<16x16xi1>
    %44 = arith.andi %38, %43 : vector<16x16xi1>
    %45 = arith.ori %33, %44 : vector<16x16xi1>
    %c8_i32_13 = arith.constant 8 : i32
    %46 = vector.broadcast %c8_i32_13 : i32 to vector<16x16xi32>
    %47 = arith.cmpi sge, %26, %46 : vector<16x16xi32>
    %c16_i32 = arith.constant 16 : i32
    %48 = vector.broadcast %c16_i32 : i32 to vector<16x16xi32>
    %49 = arith.cmpi slt, %26, %48 : vector<16x16xi32>
    %50 = arith.andi %47, %49 : vector<16x16xi1>
    %c8_i32_14 = arith.constant 8 : i32
    %51 = vector.broadcast %c8_i32_14 : i32 to vector<16x16xi32>
    %52 = arith.cmpi sge, %27, %51 : vector<16x16xi32>
    %c16_i32_15 = arith.constant 16 : i32
    %53 = vector.broadcast %c16_i32_15 : i32 to vector<16x16xi32>
    %54 = arith.cmpi slt, %27, %53 : vector<16x16xi32>
    %55 = arith.andi %52, %54 : vector<16x16xi1>
    %56 = arith.andi %50, %55 : vector<16x16xi1>
    %57 = arith.ori %45, %56 : vector<16x16xi1>
    %58 = arith.andi %31, %57 : vector<16x16xi1>
    %c0_16 = arith.constant 0 : index
    %c0_17 = arith.constant 0 : index
    %59 = vector.load %arg4[%c0_16, %c0_17] : memref<12x128xf32, #tpu.memory_space<vmem>>, vector<1x32xf32>
    %c1 = arith.constant 1 : index
    %c0_18 = arith.constant 0 : index
    %60 = vector.load %arg4[%c1, %c0_18] : memref<12x128xf32, #tpu.memory_space<vmem>>, vector<1x96xf32>
    %c2 = arith.constant 2 : index
    %c0_19 = arith.constant 0 : index
    %61 = vector.load %arg4[%c2, %c0_19] : memref<12x128xf32, #tpu.memory_space<vmem>>, vector<1x32xf32>
    %c3 = arith.constant 3 : index
    %c0_20 = arith.constant 0 : index
    %62 = vector.load %arg4[%c3, %c0_20] : memref<12x128xf32, #tpu.memory_space<vmem>>, vector<1x128xf32>
    %c4 = arith.constant 4 : index
    %c0_21 = arith.constant 0 : index
    %63 = vector.load %arg4[%c4, %c0_21] : memref<12x128xf32, #tpu.memory_space<vmem>>, vector<1x32xf32>
    %64 = arith.mulf %25, %25 : vector<16x32xf32>
    %cst_22 = arith.constant dense<0.000000e+00> : vector<16xf32>
    %65 = vector.multi_reduction <add>, %64, %cst_22 [1] : vector<16x32xf32> to vector<16xf32>
    %66 = vector.shape_cast %65 : vector<16xf32> to vector<16x1xf32>
    %cst_23 = arith.constant 3.200000e+01 : f32
    %67 = vector.broadcast %cst_23 : f32 to vector<16x1xf32>
    %68 = arith.divf %66, %67 : vector<16x1xf32>
    %cst_24 = arith.constant 9.99999997E-7 : f32
    %69 = vector.broadcast %cst_24 : f32 to vector<16x1xf32>
    %70 = arith.addf %68, %69 : vector<16x1xf32>
    %71 = math.rsqrt %70 : vector<16x1xf32>
    %72 = vector.broadcast %71 : vector<16x1xf32> to vector<16x32xf32>
    %73 = arith.mulf %25, %72 : vector<16x32xf32>
    %74 = vector.broadcast %59 : vector<1x32xf32> to vector<16x32xf32>
    %75 = arith.mulf %73, %74 : vector<16x32xf32>
    %c0_25 = arith.constant 0 : index
    %c0_26 = arith.constant 0 : index
    %c0_27 = arith.constant 0 : index
    %76 = vector.load %arg5[%c0_25, %c0_26, %c0_27] : memref<2x32x96xf32, #tpu.memory_space<vmem>>, vector<1x32x96xf32>
    %77 = vector.shape_cast %76 : vector<1x32x96xf32> to vector<32x96xf32>
    %cst_28 = arith.constant dense<0.000000e+00> : vector<16x96xf32>
    %78 = tpu.matmul %75, %77, %cst_28 {dimension_numbers = #tpu.dot_dimension_numbers<[1], [0], [0], [1], [0, 0, 1, 1], [], []>} : vector<16x32xf32>, vector<32x96xf32>, vector<16x96xf32> -> vector<16x96xf32>
    %79 = vector.broadcast %60 : vector<1x96xf32> to vector<16x96xf32>
    %80 = arith.addf %78, %79 : vector<16x96xf32>
    %81 = vector.extract_strided_slice %80 {offsets = [0, 0], sizes = [16, 32], strides = [1, 1]} : vector<16x96xf32> to vector<16x32xf32>
    %82 = vector.extract_strided_slice %80 {offsets = [0, 32], sizes = [16, 32], strides = [1, 1]} : vector<16x96xf32> to vector<16x32xf32>
    %83 = vector.extract_strided_slice %80 {offsets = [0, 64], sizes = [16, 32], strides = [1, 1]} : vector<16x96xf32> to vector<16x32xf32>
    %84 = vector.extract_strided_slice %81 {offsets = [0, 0], sizes = [16, 8], strides = [1, 1]} : vector<16x32xf32> to vector<16x8xf32>
    %85 = vector.extract_strided_slice %82 {offsets = [0, 0], sizes = [16, 8], strides = [1, 1]} : vector<16x32xf32> to vector<16x8xf32>
    %86 = vector.extract_strided_slice %83 {offsets = [0, 0], sizes = [16, 8], strides = [1, 1]} : vector<16x32xf32> to vector<16x8xf32>
    %cst_29 = arith.constant dense<0.000000e+00> : vector<16x16xf32>
    %87 = tpu.matmul %84, %85, %cst_29 {dimension_numbers = #tpu.dot_dimension_numbers<[1], [1], [0], [0], [0, 0, 1, 0], [], []>} : vector<16x8xf32>, vector<16x8xf32>, vector<16x16xf32> -> vector<16x16xf32>
    %cst_30 = arith.constant -1.000000e+30 : f32
    %88 = vector.broadcast %cst_30 : f32 to vector<16x16xf32>
    %89 = arith.select %58, %87, %88 : vector<16x16xi1>, vector<16x16xf32>
    %cst_31 = arith.constant dense<0xFF800000> : vector<16xf32>
    %90 = vector.multi_reduction <maximumf>, %89, %cst_31 [1] : vector<16x16xf32> to vector<16xf32>
    %91 = vector.shape_cast %90 : vector<16xf32> to vector<16x1xf32>
    %92 = vector.broadcast %91 : vector<16x1xf32> to vector<16x16xf32>
    %93 = arith.subf %89, %92 : vector<16x16xf32>
    %94 = math.exp %93 : vector<16x16xf32>
    %cst_32 = arith.constant dense<0.000000e+00> : vector<16xf32>
    %95 = vector.multi_reduction <add>, %94, %cst_32 [1] : vector<16x16xf32> to vector<16xf32>
    %96 = vector.shape_cast %95 : vector<16xf32> to vector<16x1xf32>
    %97 = vector.broadcast %96 : vector<16x1xf32> to vector<16x16xf32>
    %98 = arith.divf %94, %97 : vector<16x16xf32>
    %cst_33 = arith.constant dense<0.000000e+00> : vector<16x8xf32>
    %99 = tpu.matmul %98, %86, %cst_33 {dimension_numbers = #tpu.dot_dimension_numbers<[1], [0], [0], [1], [0, 0, 1, 1], [], []>} : vector<16x16xf32>, vector<16x8xf32>, vector<16x8xf32> -> vector<16x8xf32>
    %100 = vector.extract_strided_slice %81 {offsets = [0, 8], sizes = [16, 8], strides = [1, 1]} : vector<16x32xf32> to vector<16x8xf32>
    %101 = vector.extract_strided_slice %82 {offsets = [0, 8], sizes = [16, 8], strides = [1, 1]} : vector<16x32xf32> to vector<16x8xf32>
    %102 = vector.extract_strided_slice %83 {offsets = [0, 8], sizes = [16, 8], strides = [1, 1]} : vector<16x32xf32> to vector<16x8xf32>
    %cst_34 = arith.constant dense<0.000000e+00> : vector<16x16xf32>
    %103 = tpu.matmul %100, %101, %cst_34 {dimension_numbers = #tpu.dot_dimension_numbers<[1], [1], [0], [0], [0, 0, 1, 0], [], []>} : vector<16x8xf32>, vector<16x8xf32>, vector<16x16xf32> -> vector<16x16xf32>
    %cst_35 = arith.constant -1.000000e+30 : f32
    %104 = vector.broadcast %cst_35 : f32 to vector<16x16xf32>
    %105 = arith.select %58, %103, %104 : vector<16x16xi1>, vector<16x16xf32>
    %cst_36 = arith.constant dense<0xFF800000> : vector<16xf32>
    %106 = vector.multi_reduction <maximumf>, %105, %cst_36 [1] : vector<16x16xf32> to vector<16xf32>
    %107 = vector.shape_cast %106 : vector<16xf32> to vector<16x1xf32>
    %108 = vector.broadcast %107 : vector<16x1xf32> to vector<16x16xf32>
    %109 = arith.subf %105, %108 : vector<16x16xf32>
    %110 = math.exp %109 : vector<16x16xf32>
    %cst_37 = arith.constant dense<0.000000e+00> : vector<16xf32>
    %111 = vector.multi_reduction <add>, %110, %cst_37 [1] : vector<16x16xf32> to vector<16xf32>
    %112 = vector.shape_cast %111 : vector<16xf32> to vector<16x1xf32>
    %113 = vector.broadcast %112 : vector<16x1xf32> to vector<16x16xf32>
    %114 = arith.divf %110, %113 : vector<16x16xf32>
    %cst_38 = arith.constant dense<0.000000e+00> : vector<16x8xf32>
    %115 = tpu.matmul %114, %102, %cst_38 {dimension_numbers = #tpu.dot_dimension_numbers<[1], [0], [0], [1], [0, 0, 1, 1], [], []>} : vector<16x16xf32>, vector<16x8xf32>, vector<16x8xf32> -> vector<16x8xf32>
    %116 = vector.extract_strided_slice %81 {offsets = [0, 16], sizes = [16, 8], strides = [1, 1]} : vector<16x32xf32> to vector<16x8xf32>
    %117 = vector.extract_strided_slice %82 {offsets = [0, 16], sizes = [16, 8], strides = [1, 1]} : vector<16x32xf32> to vector<16x8xf32>
    %118 = vector.extract_strided_slice %83 {offsets = [0, 16], sizes = [16, 8], strides = [1, 1]} : vector<16x32xf32> to vector<16x8xf32>
    %cst_39 = arith.constant dense<0.000000e+00> : vector<16x16xf32>
    %119 = tpu.matmul %116, %117, %cst_39 {dimension_numbers = #tpu.dot_dimension_numbers<[1], [1], [0], [0], [0, 0, 1, 0], [], []>} : vector<16x8xf32>, vector<16x8xf32>, vector<16x16xf32> -> vector<16x16xf32>
    %cst_40 = arith.constant -1.000000e+30 : f32
    %120 = vector.broadcast %cst_40 : f32 to vector<16x16xf32>
    %121 = arith.select %58, %119, %120 : vector<16x16xi1>, vector<16x16xf32>
    %cst_41 = arith.constant dense<0xFF800000> : vector<16xf32>
    %122 = vector.multi_reduction <maximumf>, %121, %cst_41 [1] : vector<16x16xf32> to vector<16xf32>
    %123 = vector.shape_cast %122 : vector<16xf32> to vector<16x1xf32>
    %124 = vector.broadcast %123 : vector<16x1xf32> to vector<16x16xf32>
    %125 = arith.subf %121, %124 : vector<16x16xf32>
    %126 = math.exp %125 : vector<16x16xf32>
    %cst_42 = arith.constant dense<0.000000e+00> : vector<16xf32>
    %127 = vector.multi_reduction <add>, %126, %cst_42 [1] : vector<16x16xf32> to vector<16xf32>
    %128 = vector.shape_cast %127 : vector<16xf32> to vector<16x1xf32>
    %129 = vector.broadcast %128 : vector<16x1xf32> to vector<16x16xf32>
    %130 = arith.divf %126, %129 : vector<16x16xf32>
    %cst_43 = arith.constant dense<0.000000e+00> : vector<16x8xf32>
    %131 = tpu.matmul %130, %118, %cst_43 {dimension_numbers = #tpu.dot_dimension_numbers<[1], [0], [0], [1], [0, 0, 1, 1], [], []>} : vector<16x16xf32>, vector<16x8xf32>, vector<16x8xf32> -> vector<16x8xf32>
    %132 = vector.extract_strided_slice %81 {offsets = [0, 24], sizes = [16, 8], strides = [1, 1]} : vector<16x32xf32> to vector<16x8xf32>
    %133 = vector.extract_strided_slice %82 {offsets = [0, 24], sizes = [16, 8], strides = [1, 1]} : vector<16x32xf32> to vector<16x8xf32>
    %134 = vector.extract_strided_slice %83 {offsets = [0, 24], sizes = [16, 8], strides = [1, 1]} : vector<16x32xf32> to vector<16x8xf32>
    %cst_44 = arith.constant dense<0.000000e+00> : vector<16x16xf32>
    %135 = tpu.matmul %132, %133, %cst_44 {dimension_numbers = #tpu.dot_dimension_numbers<[1], [1], [0], [0], [0, 0, 1, 0], [], []>} : vector<16x8xf32>, vector<16x8xf32>, vector<16x16xf32> -> vector<16x16xf32>
    %cst_45 = arith.constant -1.000000e+30 : f32
    %136 = vector.broadcast %cst_45 : f32 to vector<16x16xf32>
    %137 = arith.select %58, %135, %136 : vector<16x16xi1>, vector<16x16xf32>
    %cst_46 = arith.constant dense<0xFF800000> : vector<16xf32>
    %138 = vector.multi_reduction <maximumf>, %137, %cst_46 [1] : vector<16x16xf32> to vector<16xf32>
    %139 = vector.shape_cast %138 : vector<16xf32> to vector<16x1xf32>
    %140 = vector.broadcast %139 : vector<16x1xf32> to vector<16x16xf32>
    %141 = arith.subf %137, %140 : vector<16x16xf32>
    %142 = math.exp %141 : vector<16x16xf32>
    %cst_47 = arith.constant dense<0.000000e+00> : vector<16xf32>
    %143 = vector.multi_reduction <add>, %142, %cst_47 [1] : vector<16x16xf32> to vector<16xf32>
    %144 = vector.shape_cast %143 : vector<16xf32> to vector<16x1xf32>
    %145 = vector.broadcast %144 : vector<16x1xf32> to vector<16x16xf32>
    %146 = arith.divf %142, %145 : vector<16x16xf32>
    %cst_48 = arith.constant dense<0.000000e+00> : vector<16x8xf32>
    %147 = tpu.matmul %146, %134, %cst_48 {dimension_numbers = #tpu.dot_dimension_numbers<[1], [0], [0], [1], [0, 0, 1, 1], [], []>} : vector<16x16xf32>, vector<16x8xf32>, vector<16x8xf32> -> vector<16x8xf32>
    %148 = tpu.concatenate %99, %115, %131, %147 in 1 : vector<16x8xf32>, vector<16x8xf32>, vector<16x8xf32>, vector<16x8xf32> -> vector<16x32xf32>
    %149 = arith.addf %25, %148 : vector<16x32xf32>
    %150 = arith.mulf %149, %149 : vector<16x32xf32>
    %cst_49 = arith.constant dense<0.000000e+00> : vector<16xf32>
    %151 = vector.multi_reduction <add>, %150, %cst_49 [1] : vector<16x32xf32> to vector<16xf32>
    %152 = vector.shape_cast %151 : vector<16xf32> to vector<16x1xf32>
    %cst_50 = arith.constant 3.200000e+01 : f32
    %153 = vector.broadcast %cst_50 : f32 to vector<16x1xf32>
    %154 = arith.divf %152, %153 : vector<16x1xf32>
    %cst_51 = arith.constant 9.99999997E-7 : f32
    %155 = vector.broadcast %cst_51 : f32 to vector<16x1xf32>
    %156 = arith.addf %154, %155 : vector<16x1xf32>
    %157 = math.rsqrt %156 : vector<16x1xf32>
    %158 = vector.broadcast %157 : vector<16x1xf32> to vector<16x32xf32>
    %159 = arith.mulf %149, %158 : vector<16x32xf32>
    %160 = vector.broadcast %61 : vector<1x32xf32> to vector<16x32xf32>
    %161 = arith.mulf %159, %160 : vector<16x32xf32>
    %c0_52 = arith.constant 0 : index
    %c0_53 = arith.constant 0 : index
    %c0_54 = arith.constant 0 : index
    %162 = vector.load %arg6[%c0_52, %c0_53, %c0_54] : memref<2x32x128xf32, #tpu.memory_space<vmem>>, vector<1x32x128xf32>
    %163 = vector.shape_cast %162 : vector<1x32x128xf32> to vector<32x128xf32>
    %cst_55 = arith.constant dense<0.000000e+00> : vector<16x128xf32>
    %164 = tpu.matmul %161, %163, %cst_55 {dimension_numbers = #tpu.dot_dimension_numbers<[1], [0], [0], [1], [0, 0, 1, 1], [], []>} : vector<16x32xf32>, vector<32x128xf32>, vector<16x128xf32> -> vector<16x128xf32>
    %165 = vector.broadcast %62 : vector<1x128xf32> to vector<16x128xf32>
    %166 = arith.addf %164, %165 : vector<16x128xf32>
    %167 = vector.extract_strided_slice %166 {offsets = [0, 0], sizes = [16, 64], strides = [1, 1]} : vector<16x128xf32> to vector<16x64xf32>
    %168 = vector.extract_strided_slice %166 {offsets = [0, 64], sizes = [16, 64], strides = [1, 1]} : vector<16x128xf32> to vector<16x64xf32>
    %169 = arith.negf %167 : vector<16x64xf32>
    %170 = math.exp %169 : vector<16x64xf32>
    %cst_56 = arith.constant 1.000000e+00 : f32
    %171 = vector.broadcast %cst_56 : f32 to vector<16x64xf32>
    %172 = arith.addf %171, %170 : vector<16x64xf32>
    %173 = arith.divf %171, %172 : vector<16x64xf32>
    %174 = arith.mulf %167, %173 : vector<16x64xf32>
    %175 = arith.mulf %174, %168 : vector<16x64xf32>
    %c0_57 = arith.constant 0 : index
    %c0_58 = arith.constant 0 : index
    %c0_59 = arith.constant 0 : index
    %176 = vector.load %arg7[%c0_57, %c0_58, %c0_59] : memref<2x64x32xf32, #tpu.memory_space<vmem>>, vector<1x64x32xf32>
    %177 = vector.shape_cast %176 : vector<1x64x32xf32> to vector<64x32xf32>
    %cst_60 = arith.constant dense<0.000000e+00> : vector<16x32xf32>
    %178 = tpu.matmul %175, %177, %cst_60 {dimension_numbers = #tpu.dot_dimension_numbers<[1], [0], [0], [1], [0, 0, 1, 1], [], []>} : vector<16x64xf32>, vector<64x32xf32>, vector<16x32xf32> -> vector<16x32xf32>
    %179 = vector.broadcast %63 : vector<1x32xf32> to vector<16x32xf32>
    %180 = arith.addf %178, %179 : vector<16x32xf32>
    %181 = arith.addf %149, %180 : vector<16x32xf32>
    %c5 = arith.constant 5 : index
    %c0_61 = arith.constant 0 : index
    %182 = vector.load %arg4[%c5, %c0_61] : memref<12x128xf32, #tpu.memory_space<vmem>>, vector<1x32xf32>
    %c6 = arith.constant 6 : index
    %c0_62 = arith.constant 0 : index
    %183 = vector.load %arg4[%c6, %c0_62] : memref<12x128xf32, #tpu.memory_space<vmem>>, vector<1x96xf32>
    %c7 = arith.constant 7 : index
    %c0_63 = arith.constant 0 : index
    %184 = vector.load %arg4[%c7, %c0_63] : memref<12x128xf32, #tpu.memory_space<vmem>>, vector<1x32xf32>
    %c8 = arith.constant 8 : index
    %c0_64 = arith.constant 0 : index
    %185 = vector.load %arg4[%c8, %c0_64] : memref<12x128xf32, #tpu.memory_space<vmem>>, vector<1x128xf32>
    %c9 = arith.constant 9 : index
    %c0_65 = arith.constant 0 : index
    %186 = vector.load %arg4[%c9, %c0_65] : memref<12x128xf32, #tpu.memory_space<vmem>>, vector<1x32xf32>
    %187 = arith.mulf %181, %181 : vector<16x32xf32>
    %cst_66 = arith.constant dense<0.000000e+00> : vector<16xf32>
    %188 = vector.multi_reduction <add>, %187, %cst_66 [1] : vector<16x32xf32> to vector<16xf32>
    %189 = vector.shape_cast %188 : vector<16xf32> to vector<16x1xf32>
    %cst_67 = arith.constant 3.200000e+01 : f32
    %190 = vector.broadcast %cst_67 : f32 to vector<16x1xf32>
    %191 = arith.divf %189, %190 : vector<16x1xf32>
    %cst_68 = arith.constant 9.99999997E-7 : f32
    %192 = vector.broadcast %cst_68 : f32 to vector<16x1xf32>
    %193 = arith.addf %191, %192 : vector<16x1xf32>
    %194 = math.rsqrt %193 : vector<16x1xf32>
    %195 = vector.broadcast %194 : vector<16x1xf32> to vector<16x32xf32>
    %196 = arith.mulf %181, %195 : vector<16x32xf32>
    %197 = vector.broadcast %182 : vector<1x32xf32> to vector<16x32xf32>
    %198 = arith.mulf %196, %197 : vector<16x32xf32>
    %c1_69 = arith.constant 1 : index
    %c0_70 = arith.constant 0 : index
    %c0_71 = arith.constant 0 : index
    %199 = vector.load %arg5[%c1_69, %c0_70, %c0_71] : memref<2x32x96xf32, #tpu.memory_space<vmem>>, vector<1x32x96xf32>
    %200 = vector.shape_cast %199 : vector<1x32x96xf32> to vector<32x96xf32>
    %cst_72 = arith.constant dense<0.000000e+00> : vector<16x96xf32>
    %201 = tpu.matmul %198, %200, %cst_72 {dimension_numbers = #tpu.dot_dimension_numbers<[1], [0], [0], [1], [0, 0, 1, 1], [], []>} : vector<16x32xf32>, vector<32x96xf32>, vector<16x96xf32> -> vector<16x96xf32>
    %202 = vector.broadcast %183 : vector<1x96xf32> to vector<16x96xf32>
    %203 = arith.addf %201, %202 : vector<16x96xf32>
    %204 = vector.extract_strided_slice %203 {offsets = [0, 0], sizes = [16, 32], strides = [1, 1]} : vector<16x96xf32> to vector<16x32xf32>
    %205 = vector.extract_strided_slice %203 {offsets = [0, 32], sizes = [16, 32], strides = [1, 1]} : vector<16x96xf32> to vector<16x32xf32>
    %206 = vector.extract_strided_slice %203 {offsets = [0, 64], sizes = [16, 32], strides = [1, 1]} : vector<16x96xf32> to vector<16x32xf32>
    %207 = vector.extract_strided_slice %204 {offsets = [0, 0], sizes = [16, 8], strides = [1, 1]} : vector<16x32xf32> to vector<16x8xf32>
    %208 = vector.extract_strided_slice %205 {offsets = [0, 0], sizes = [16, 8], strides = [1, 1]} : vector<16x32xf32> to vector<16x8xf32>
    %209 = vector.extract_strided_slice %206 {offsets = [0, 0], sizes = [16, 8], strides = [1, 1]} : vector<16x32xf32> to vector<16x8xf32>
    %cst_73 = arith.constant dense<0.000000e+00> : vector<16x16xf32>
    %210 = tpu.matmul %207, %208, %cst_73 {dimension_numbers = #tpu.dot_dimension_numbers<[1], [1], [0], [0], [0, 0, 1, 0], [], []>} : vector<16x8xf32>, vector<16x8xf32>, vector<16x16xf32> -> vector<16x16xf32>
    %cst_74 = arith.constant -1.000000e+30 : f32
    %211 = vector.broadcast %cst_74 : f32 to vector<16x16xf32>
    %212 = arith.select %58, %210, %211 : vector<16x16xi1>, vector<16x16xf32>
    %cst_75 = arith.constant dense<0xFF800000> : vector<16xf32>
    %213 = vector.multi_reduction <maximumf>, %212, %cst_75 [1] : vector<16x16xf32> to vector<16xf32>
    %214 = vector.shape_cast %213 : vector<16xf32> to vector<16x1xf32>
    %215 = vector.broadcast %214 : vector<16x1xf32> to vector<16x16xf32>
    %216 = arith.subf %212, %215 : vector<16x16xf32>
    %217 = math.exp %216 : vector<16x16xf32>
    %cst_76 = arith.constant dense<0.000000e+00> : vector<16xf32>
    %218 = vector.multi_reduction <add>, %217, %cst_76 [1] : vector<16x16xf32> to vector<16xf32>
    %219 = vector.shape_cast %218 : vector<16xf32> to vector<16x1xf32>
    %220 = vector.broadcast %219 : vector<16x1xf32> to vector<16x16xf32>
    %221 = arith.divf %217, %220 : vector<16x16xf32>
    %cst_77 = arith.constant dense<0.000000e+00> : vector<16x8xf32>
    %222 = tpu.matmul %221, %209, %cst_77 {dimension_numbers = #tpu.dot_dimension_numbers<[1], [0], [0], [1], [0, 0, 1, 1], [], []>} : vector<16x16xf32>, vector<16x8xf32>, vector<16x8xf32> -> vector<16x8xf32>
    %223 = vector.extract_strided_slice %204 {offsets = [0, 8], sizes = [16, 8], strides = [1, 1]} : vector<16x32xf32> to vector<16x8xf32>
    %224 = vector.extract_strided_slice %205 {offsets = [0, 8], sizes = [16, 8], strides = [1, 1]} : vector<16x32xf32> to vector<16x8xf32>
    %225 = vector.extract_strided_slice %206 {offsets = [0, 8], sizes = [16, 8], strides = [1, 1]} : vector<16x32xf32> to vector<16x8xf32>
    %cst_78 = arith.constant dense<0.000000e+00> : vector<16x16xf32>
    %226 = tpu.matmul %223, %224, %cst_78 {dimension_numbers = #tpu.dot_dimension_numbers<[1], [1], [0], [0], [0, 0, 1, 0], [], []>} : vector<16x8xf32>, vector<16x8xf32>, vector<16x16xf32> -> vector<16x16xf32>
    %cst_79 = arith.constant -1.000000e+30 : f32
    %227 = vector.broadcast %cst_79 : f32 to vector<16x16xf32>
    %228 = arith.select %58, %226, %227 : vector<16x16xi1>, vector<16x16xf32>
    %cst_80 = arith.constant dense<0xFF800000> : vector<16xf32>
    %229 = vector.multi_reduction <maximumf>, %228, %cst_80 [1] : vector<16x16xf32> to vector<16xf32>
    %230 = vector.shape_cast %229 : vector<16xf32> to vector<16x1xf32>
    %231 = vector.broadcast %230 : vector<16x1xf32> to vector<16x16xf32>
    %232 = arith.subf %228, %231 : vector<16x16xf32>
    %233 = math.exp %232 : vector<16x16xf32>
    %cst_81 = arith.constant dense<0.000000e+00> : vector<16xf32>
    %234 = vector.multi_reduction <add>, %233, %cst_81 [1] : vector<16x16xf32> to vector<16xf32>
    %235 = vector.shape_cast %234 : vector<16xf32> to vector<16x1xf32>
    %236 = vector.broadcast %235 : vector<16x1xf32> to vector<16x16xf32>
    %237 = arith.divf %233, %236 : vector<16x16xf32>
    %cst_82 = arith.constant dense<0.000000e+00> : vector<16x8xf32>
    %238 = tpu.matmul %237, %225, %cst_82 {dimension_numbers = #tpu.dot_dimension_numbers<[1], [0], [0], [1], [0, 0, 1, 1], [], []>} : vector<16x16xf32>, vector<16x8xf32>, vector<16x8xf32> -> vector<16x8xf32>
    %239 = vector.extract_strided_slice %204 {offsets = [0, 16], sizes = [16, 8], strides = [1, 1]} : vector<16x32xf32> to vector<16x8xf32>
    %240 = vector.extract_strided_slice %205 {offsets = [0, 16], sizes = [16, 8], strides = [1, 1]} : vector<16x32xf32> to vector<16x8xf32>
    %241 = vector.extract_strided_slice %206 {offsets = [0, 16], sizes = [16, 8], strides = [1, 1]} : vector<16x32xf32> to vector<16x8xf32>
    %cst_83 = arith.constant dense<0.000000e+00> : vector<16x16xf32>
    %242 = tpu.matmul %239, %240, %cst_83 {dimension_numbers = #tpu.dot_dimension_numbers<[1], [1], [0], [0], [0, 0, 1, 0], [], []>} : vector<16x8xf32>, vector<16x8xf32>, vector<16x16xf32> -> vector<16x16xf32>
    %cst_84 = arith.constant -1.000000e+30 : f32
    %243 = vector.broadcast %cst_84 : f32 to vector<16x16xf32>
    %244 = arith.select %58, %242, %243 : vector<16x16xi1>, vector<16x16xf32>
    %cst_85 = arith.constant dense<0xFF800000> : vector<16xf32>
    %245 = vector.multi_reduction <maximumf>, %244, %cst_85 [1] : vector<16x16xf32> to vector<16xf32>
    %246 = vector.shape_cast %245 : vector<16xf32> to vector<16x1xf32>
    %247 = vector.broadcast %246 : vector<16x1xf32> to vector<16x16xf32>
    %248 = arith.subf %244, %247 : vector<16x16xf32>
    %249 = math.exp %248 : vector<16x16xf32>
    %cst_86 = arith.constant dense<0.000000e+00> : vector<16xf32>
    %250 = vector.multi_reduction <add>, %249, %cst_86 [1] : vector<16x16xf32> to vector<16xf32>
    %251 = vector.shape_cast %250 : vector<16xf32> to vector<16x1xf32>
    %252 = vector.broadcast %251 : vector<16x1xf32> to vector<16x16xf32>
    %253 = arith.divf %249, %252 : vector<16x16xf32>
    %cst_87 = arith.constant dense<0.000000e+00> : vector<16x8xf32>
    %254 = tpu.matmul %253, %241, %cst_87 {dimension_numbers = #tpu.dot_dimension_numbers<[1], [0], [0], [1], [0, 0, 1, 1], [], []>} : vector<16x16xf32>, vector<16x8xf32>, vector<16x8xf32> -> vector<16x8xf32>
    %255 = vector.extract_strided_slice %204 {offsets = [0, 24], sizes = [16, 8], strides = [1, 1]} : vector<16x32xf32> to vector<16x8xf32>
    %256 = vector.extract_strided_slice %205 {offsets = [0, 24], sizes = [16, 8], strides = [1, 1]} : vector<16x32xf32> to vector<16x8xf32>
    %257 = vector.extract_strided_slice %206 {offsets = [0, 24], sizes = [16, 8], strides = [1, 1]} : vector<16x32xf32> to vector<16x8xf32>
    %cst_88 = arith.constant dense<0.000000e+00> : vector<16x16xf32>
    %258 = tpu.matmul %255, %256, %cst_88 {dimension_numbers = #tpu.dot_dimension_numbers<[1], [1], [0], [0], [0, 0, 1, 0], [], []>} : vector<16x8xf32>, vector<16x8xf32>, vector<16x16xf32> -> vector<16x16xf32>
    %cst_89 = arith.constant -1.000000e+30 : f32
    %259 = vector.broadcast %cst_89 : f32 to vector<16x16xf32>
    %260 = arith.select %58, %258, %259 : vector<16x16xi1>, vector<16x16xf32>
    %cst_90 = arith.constant dense<0xFF800000> : vector<16xf32>
    %261 = vector.multi_reduction <maximumf>, %260, %cst_90 [1] : vector<16x16xf32> to vector<16xf32>
    %262 = vector.shape_cast %261 : vector<16xf32> to vector<16x1xf32>
    %263 = vector.broadcast %262 : vector<16x1xf32> to vector<16x16xf32>
    %264 = arith.subf %260, %263 : vector<16x16xf32>
    %265 = math.exp %264 : vector<16x16xf32>
    %cst_91 = arith.constant dense<0.000000e+00> : vector<16xf32>
    %266 = vector.multi_reduction <add>, %265, %cst_91 [1] : vector<16x16xf32> to vector<16xf32>
    %267 = vector.shape_cast %266 : vector<16xf32> to vector<16x1xf32>
    %268 = vector.broadcast %267 : vector<16x1xf32> to vector<16x16xf32>
    %269 = arith.divf %265, %268 : vector<16x16xf32>
    %cst_92 = arith.constant dense<0.000000e+00> : vector<16x8xf32>
    %270 = tpu.matmul %269, %257, %cst_92 {dimension_numbers = #tpu.dot_dimension_numbers<[1], [0], [0], [1], [0, 0, 1, 1], [], []>} : vector<16x16xf32>, vector<16x8xf32>, vector<16x8xf32> -> vector<16x8xf32>
    %271 = tpu.concatenate %222, %238, %254, %270 in 1 : vector<16x8xf32>, vector<16x8xf32>, vector<16x8xf32>, vector<16x8xf32> -> vector<16x32xf32>
    %272 = arith.addf %181, %271 : vector<16x32xf32>
    %273 = arith.mulf %272, %272 : vector<16x32xf32>
    %cst_93 = arith.constant dense<0.000000e+00> : vector<16xf32>
    %274 = vector.multi_reduction <add>, %273, %cst_93 [1] : vector<16x32xf32> to vector<16xf32>
    %275 = vector.shape_cast %274 : vector<16xf32> to vector<16x1xf32>
    %cst_94 = arith.constant 3.200000e+01 : f32
    %276 = vector.broadcast %cst_94 : f32 to vector<16x1xf32>
    %277 = arith.divf %275, %276 : vector<16x1xf32>
    %cst_95 = arith.constant 9.99999997E-7 : f32
    %278 = vector.broadcast %cst_95 : f32 to vector<16x1xf32>
    %279 = arith.addf %277, %278 : vector<16x1xf32>
    %280 = math.rsqrt %279 : vector<16x1xf32>
    %281 = vector.broadcast %280 : vector<16x1xf32> to vector<16x32xf32>
    %282 = arith.mulf %272, %281 : vector<16x32xf32>
    %283 = vector.broadcast %184 : vector<1x32xf32> to vector<16x32xf32>
    %284 = arith.mulf %282, %283 : vector<16x32xf32>
    %c1_96 = arith.constant 1 : index
    %c0_97 = arith.constant 0 : index
    %c0_98 = arith.constant 0 : index
    %285 = vector.load %arg6[%c1_96, %c0_97, %c0_98] : memref<2x32x128xf32, #tpu.memory_space<vmem>>, vector<1x32x128xf32>
    %286 = vector.shape_cast %285 : vector<1x32x128xf32> to vector<32x128xf32>
    %cst_99 = arith.constant dense<0.000000e+00> : vector<16x128xf32>
    %287 = tpu.matmul %284, %286, %cst_99 {dimension_numbers = #tpu.dot_dimension_numbers<[1], [0], [0], [1], [0, 0, 1, 1], [], []>} : vector<16x32xf32>, vector<32x128xf32>, vector<16x128xf32> -> vector<16x128xf32>
    %288 = vector.broadcast %185 : vector<1x128xf32> to vector<16x128xf32>
    %289 = arith.addf %287, %288 : vector<16x128xf32>
    %290 = vector.extract_strided_slice %289 {offsets = [0, 0], sizes = [16, 64], strides = [1, 1]} : vector<16x128xf32> to vector<16x64xf32>
    %291 = vector.extract_strided_slice %289 {offsets = [0, 64], sizes = [16, 64], strides = [1, 1]} : vector<16x128xf32> to vector<16x64xf32>
    %292 = arith.negf %290 : vector<16x64xf32>
    %293 = math.exp %292 : vector<16x64xf32>
    %cst_100 = arith.constant 1.000000e+00 : f32
    %294 = vector.broadcast %cst_100 : f32 to vector<16x64xf32>
    %295 = arith.addf %294, %293 : vector<16x64xf32>
    %296 = arith.divf %294, %295 : vector<16x64xf32>
    %297 = arith.mulf %290, %296 : vector<16x64xf32>
    %298 = arith.mulf %297, %291 : vector<16x64xf32>
    %c1_101 = arith.constant 1 : index
    %c0_102 = arith.constant 0 : index
    %c0_103 = arith.constant 0 : index
    %299 = vector.load %arg7[%c1_101, %c0_102, %c0_103] : memref<2x64x32xf32, #tpu.memory_space<vmem>>, vector<1x64x32xf32>
    %300 = vector.shape_cast %299 : vector<1x64x32xf32> to vector<64x32xf32>
    %cst_104 = arith.constant dense<0.000000e+00> : vector<16x32xf32>
    %301 = tpu.matmul %298, %300, %cst_104 {dimension_numbers = #tpu.dot_dimension_numbers<[1], [0], [0], [1], [0, 0, 1, 1], [], []>} : vector<16x64xf32>, vector<64x32xf32>, vector<16x32xf32> -> vector<16x32xf32>
    %302 = vector.broadcast %186 : vector<1x32xf32> to vector<16x32xf32>
    %303 = arith.addf %301, %302 : vector<16x32xf32>
    %304 = arith.addf %272, %303 : vector<16x32xf32>
    %c10 = arith.constant 10 : index
    %c0_105 = arith.constant 0 : index
    %305 = vector.load %arg4[%c10, %c0_105] : memref<12x128xf32, #tpu.memory_space<vmem>>, vector<1x32xf32>
    %c11 = arith.constant 11 : index
    %c0_106 = arith.constant 0 : index
    %306 = vector.load %arg4[%c11, %c0_106] : memref<12x128xf32, #tpu.memory_space<vmem>>, vector<1x128xf32>
    %307 = arith.mulf %304, %304 : vector<16x32xf32>
    %cst_107 = arith.constant dense<0.000000e+00> : vector<16xf32>
    %308 = vector.multi_reduction <add>, %307, %cst_107 [1] : vector<16x32xf32> to vector<16xf32>
    %309 = vector.shape_cast %308 : vector<16xf32> to vector<16x1xf32>
    %cst_108 = arith.constant 3.200000e+01 : f32
    %310 = vector.broadcast %cst_108 : f32 to vector<16x1xf32>
    %311 = arith.divf %309, %310 : vector<16x1xf32>
    %cst_109 = arith.constant 9.99999997E-7 : f32
    %312 = vector.broadcast %cst_109 : f32 to vector<16x1xf32>
    %313 = arith.addf %311, %312 : vector<16x1xf32>
    %314 = math.rsqrt %313 : vector<16x1xf32>
    %315 = vector.broadcast %314 : vector<16x1xf32> to vector<16x32xf32>
    %316 = arith.mulf %304, %315 : vector<16x32xf32>
    %317 = vector.broadcast %305 : vector<1x32xf32> to vector<16x32xf32>
    %318 = arith.mulf %316, %317 : vector<16x32xf32>
    %c0_110 = arith.constant 0 : index
    %c0_111 = arith.constant 0 : index
    %319 = vector.load %arg8[%c0_110, %c0_111] : memref<32x128xf32, #tpu.memory_space<vmem>>, vector<32x128xf32>
    %cst_112 = arith.constant dense<0.000000e+00> : vector<16x128xf32>
    %320 = tpu.matmul %318, %319, %cst_112 {dimension_numbers = #tpu.dot_dimension_numbers<[1], [0], [0], [1], [0, 0, 1, 1], [], []>} : vector<16x32xf32>, vector<32x128xf32>, vector<16x128xf32> -> vector<16x128xf32>
    %321 = vector.broadcast %306 : vector<1x128xf32> to vector<16x128xf32>
    %322 = arith.addf %320, %321 : vector<16x128xf32>
    %c0_113 = arith.constant 0 : index
    %c0_114 = arith.constant 0 : index
    %323 = vector.load %arg9[%c0_113, %c0_114] : memref<16x128xf32, #tpu.memory_space<vmem>>, vector<16x128xf32>
    tpu.vector_store %arg9[%c0_113, %c0_114], %322 {strides = array<i32>} : memref<16x128xf32, #tpu.memory_space<vmem>>, vector<16x128xf32>,
    return
  }
}

</mosaic_0001>

<bundles_post_ra>
// kernel: _lambda_.1
= control target key start
LH: loop header
LB: loop body
LE: loop exit
PB: predicated region body
PF: predicated region fallthrough
CT: control target
= control target key end

     0   :  { %v3378_v2 = vmov 0   ;;  %s3989_s0 = inlined_call_operand.vmem [shape: s32[16,1], index: 0, kind: input, shape index: {}]   ;;  %s3990_s1 = inlined_call_operand.vmem [shape: s32[16,1], index: 1, kind: input, shape index: {}]   ;;  %s3991_s2 = inlined_call_operand.vmem [shape: bf16[16,32], index: 2, kind: input, shape index: {}]   ;;  %s3992_s3 = inlined_call_operand.vmem [shape: bf16[8,32], index: 3, kind: input, shape index: {}]   ;;  %s3993_s4 = inlined_call_operand.vmem [shape: f32[12,128], index: 4, kind: input, shape index: {}]   ;;  %s3994_s5 = inlined_call_operand.vmem [shape: f32[2,32,96], index: 5, kind: input, shape index: {}]   ;;  %s3995_s6 = inlined_call_operand.vmem [shape: f32[2,32,128], index: 6, kind: input, shape index: {}]   ;;  %s3996_s7 = inlined_call_operand.vmem [shape: f32[2,64,32], index: 7, kind: input, shape index: {}]   ;;  %s3997_s8 = inlined_call_operand.vmem [shape: f32[32,128], index: 8, kind: input, shape index: {}]   ;;  %s3998_s9 = inlined_call_operand.hbm [shape: f32[16,128], index: 9, kind: output, shape index: {}]  }
   0x1   :  { %v35_v0 = vld [vmem:[%s3989_s0 + $0x8] sm:$0xff]  ;;  %v34_v1 = vld [vmem:[%s3989_s0] sm:$0xff]  ;;  %3255 = vset.pattern.permute.xlu1 %v3378_v2  ;;  %3254 = vset.pattern.permute.xlu0 %v3378_v2 }
   0x2   :  { %v2895_v3 = vld [vmem:[%s3991_s2] sm:$0xff]   ;;  %42 = vperm.xlu1 %3255, %v35_v0   ;;  %39 = vperm.xlu0 %3254, %v34_v1  }
   0x3   :  { %v150_v4 = vld [vmem:[%s3992_s3] sm:$0xf]  ;;  %v2897_v5 = vunpack.c.h.bf16 %v2895_v3 }
   0x4   :  { %v151_v6 = vunpack.c.l.bf16 %v150_v4 }
   0x5   :  { %14 = vsyncpa [#allocation3], 0  ;;  %v51_v7 = vld [vmem:[%s3990_s1 + $0x8] sm:$0xff]  ;;  %v50_v8 = vld [vmem:[%s3990_s1] sm:$0xff]  ;;  %v2896_v9 = vunpack.c.l.bf16 %v2895_v3  ;;  %3019 = vmatprep.subr.mxu0 %v2897_v5  ;;  %v36_v10 = vlaneseq  ;;  %vm68_vm0 = vcmask 130048   ;;  %v3379_v14 = vmov 0.0  }
   0x6   :  { %3026 = vmatprep.subr.mxu1 %v151_v6  ;;  %3020 = vmatpush3.msra.mxu0 %v2897_v5  ;;  %vm152_vm3 = vcmask 64512   ;;  %vm291_vm6 = vcmask 261120   ;;  %v316_v36 = vld [vmem:[%s3994_s5 + $0x18] sm:$0xff]  ;;  %v315_v37 = vld [vmem:[%s3994_s5 + $0x10] sm:$0xff]  ;;  %v314_v38 = vld [vmem:[%s3994_s5 + $0x8] sm:$0xff]  ;;  %s3380_s29 = smov 96  }
   0x7   :  { %3027 = vmatpush3.msra.mxu1 %v151_v6  ;;  %56 = vperm.xlu1 %3255, %v51_v7   ;;  %v3465_v11 = vand.u32 127, %v36_v10  ;;  %v313_v39 = vld [vmem:[%s3994_s5] sm:$0xff]  ;;  %s3381_s30 = smov 88   ;;  %s3382_s10 = smov 120   ;;  %v242_v0 = vshrl.u32 %v36_v10, 7  ;;  %vm1236_vm15 = vcmask 195584  }
   0x8   :  { %53 = vperm.xlu0 %3254, %v50_v8   ;;  %3021 = vmatprep.subr.mxu0 %v2896_v9  ;;  %v2800_v47 = vld [vmem:[%s3993_s4] ss:$0 sm:$0xff]  ;;  %v2801_v53 = vld [vmem:[%s3993_s4 + $0x1] ss:$0 sm:$0xff]  ;;  %s3383_s11 = smov 64   ;;  %s3384_s12 = smov 56  }
   0x9   :  { %3022 = vmatpush3.msra.mxu0 %v2896_v9  ;;  %3031 = vmatprep.subr.mxu1 %v316_v36  ;;  %v243_v1 = vadd.s32 8, %v242_v0  ;;  %v244_v3 = vsub.s32 %v242_v0, %v3465_v11  ;;  %vm275_vm7 = vcmp.ge.s32.totalorder %v3465_v11, 8  ;;  %vm276_vm8 = vcmp.lt.s32.totalorder %v3465_v11, 16  ;;  %s3385_s13 = smov 80   ;;  %s3386_s14 = smov 112  }
   0xa   :  { %vm277_vm10 = vmand %vm275_vm7, %vm276_vm8  ;;  %vm263_vm12 = vcmp.lt.s32.totalorder %v3465_v11, 8  ;;  %s3387_s15 = smov 48   ;;  %s3388_s16 = smov 72  }
   0xb   :  { %v245_v2 = vsub.s32 %v243_v1, %v3465_v11  ;;  %v247_v5 = vsub.s32 0, %v244_v3  ;;  %s3389_s17 = smov 104   ;;  %s3390_s18 = smov 40  }
   0xc   :  { %s3391_s0 = smov 8   ;;  %s3392_s19 = smov 16  }
   0xd   :  { %v250_v4 = vsub.s32 0, %v245_v2  ;;  %v2798_v7 = vmin.u32 %v247_v5, %v244_v3  ;;  %s3393_s1 = smov 24   ;;  %s3394_s27 = smov [#allocation2]  }
   0xe   :  { %s2779_s28 = sshll.u32 %s3394_s27, 4  ;;  %s2780_s28 = int_to_ptr.vmem [resolvable:$true] %s2779_s28 }
   0xf   :  { %v2799_v6 = vmin.u32 %v250_v4, %v245_v2  ;;  %vm252_vm11 = vcmp.le.s32.totalorder %v2798_v7, 2  ;;  %s3356_s2 = scalar_lea.vmem %s2780_s28, 256  ;;  %p3361_p1 = scmp.lt.s32.totalorder %s2780_s28, %s2780_s28 }
  0x10   :  { %vm3547_vm14 = vmand %vm252_vm11, %vm263_vm12  ;;  %p3357_p0 = scmp.ne.s32.totalorder %s2780_s28, %s3356_s2  ;;  %p3362_p2 = scmp.lt.s32.totalorder %s3356_s2, %s3356_s2 }
  0x11   :  { %vm253_vm9 = vcmp.le.s32.totalorder %v2799_v6, 2 }
  0x12   :  { %vm3543_vm13 = vmand %vm253_vm9, %vm277_vm10  ;;  %p3363_p3 = por %p3362_p2, %p3361_p1 }
  0x14   :  { %p3364_p4 = pnand %p3363_p3, %p3357_p0 }
  0x7d   :  { %v43_v12 = vpop.permute.xlu1 %42  ;;  %v40_v13 = vpop.permute.xlu0 %39 }
  0x7e   :  { %vm45_vm1 = vcmp.eq.s32.totalorder %v43_v12, %v3465_v11  ;;  %vm44_vm2 = vcmp.eq.s32.totalorder %v40_v13, %v3465_v11 }
  0x7f   :  { %v2791_v15 = vsel %vm45_vm1, 1.0, %v3379_v14  ;;  %v2790_v16 = vsel %vm44_vm2, 1.0, %v3379_v14  ;;  %vm1388_vm1 = vcmask 523264  }
  0x80   :  { %3023 = vmatprep.mubr.msk.f32.mxu0 %vm68_vm0, %v2790_v16 }
  0x81   :  { %3024 = vmatmul.mubr.msk.f32.vlgmr.msra.gmra.mxu0 %vm68_vm0, %v2791_v15 }
  0x82   :  { %v57_v17 = vpop.permute.xlu1 %56 }
  0x83   :  { %v54_v18 = vpop.permute.xlu0 %53  ;;  %vm59_vm4 = vcmp.eq.s32.totalorder %v57_v17, %v3465_v11 }
  0x84   :  { %vm58_vm5 = vcmp.eq.s32.totalorder %v54_v18, %v3465_v11  ;;  %v2793_v19 = vsel %vm59_vm4, 1.0, %v3379_v14 }
  0x85   :  { %v2792_v20 = vsel %vm58_vm5, 1.0, %v3379_v14 }
  0x86   :  { %3028 = vmatprep.mubr.msk.f32.mxu1 %vm152_vm3, %v2792_v20 }
  0x87   :  { %3029 = vmatmul.mubr.msk.f32.vlgmr.msra.gmra.mxu1 %vm152_vm3, %v2793_v19 }
  0x88   :  { %3032 = vmatpush3.msra.mxu1 %v316_v36 }
  0x89   :  { %3033 = vmatprep.subr.mxu1 %v315_v37 }
  0x8a   :  { %3034 = vmatpush3.msra.mxu1 %v315_v37 }
  0x8b   :  { %3035 = vmatprep.subr.mxu1 %v314_v38 }
  0x8c   :  { %3036 = vmatpush3.msra.mxu1 %v314_v38 }
  0x8d   :  { %3037 = vmatprep.subr.mxu1 %v313_v39 }
  0x8e   :  { %3038 = vmatpush3.msra.mxu1 %v313_v39 }
 0x141   :  { %v3025_v21 = vpop.f32.mrf.mxu0 }
 0x143   :  { %v141_v22 = vpop.f32.mrf.mxu0 }
 0x144   :  { %v234_v24 = vpack.c.bf16 %v3025_v21, %v141_v22 }
 0x146   :  { %v235_v27 = vmul.bf16 1085620405, %v234_v24 }
 0x147   :  { %v3030_v23 = vpop.f32.mrf.mxu1 }
 0x149   :  { %v225_v25 = vpop.f32.mrf.mxu1 }
 0x14a   :  { %v236_v26 = vpack.c.bf16 %v3030_v23, %v225_v25 }
 0x14c   :  { %v237_v28 = vmul.bf16 1085620405, %v236_v26 }
 0x14e   :  { %v238_v29 = vadd.bf16 %v237_v28, %v235_v27 }
 0x150   :  { %v3475_v30 = vunpack.c.l.bf16 %v238_v29  ;;  %v3477_v31 = vunpack.c.h.bf16 %v238_v29 }
 0x152   :  { %v290_v32 = vmul.f32 %v3477_v31, %v3477_v31  ;;  %v289_v33 = vmul.f32 %v3475_v30, %v3475_v30 }
 0x154   :  { %v295_v34 = vsel %vm291_vm6, %v290_v32, 0.0  ;;  %v292_v35 = vsel %vm291_vm6, %v289_v33, 0.0 }
 0x155   :  { %296 = vadd.xlane.f32.xlu1 %v295_v34  ;;  %293 = vadd.xlane.f32.xlu0 %v292_v35 }
 0x1de   :  { %v297_v40 = vpop.xlane.xlu1 %296  ;;  %v294_v41 = vpop.xlane.xlu0 %293 }
 0x1df   :  { %v300_v42 = vmul.f32 0.03125, %v297_v40  ;;  %v299_v43 = vmul.f32 0.03125, %v294_v41 }
 0x1e1   :  { %v302_v44 = vadd.f32 1e-06, %v300_v42  ;;  %v301_v45 = vadd.f32 1e-06, %v299_v43 }
 0x1e3   :  { %3256 = vrsqrt.f32 %v302_v44 }
 0x1e4   :  { %3258 = vrsqrt.f32 %v301_v45 }
 0x1f0   :  { %v3257_v46 = vpop.eup %3256 }
 0x1f1   :  { %v3259_v48 = vpop.eup %3258  ;;  %v306_v49 = vmul.f32 %v3257_v46, %v3477_v31 }
 0x1f2   :  { %v305_v50 = vmul.f32 %v3259_v48, %v3475_v30 }
 0x1f3   :  { %v312_v51 = vmul.f32 %v2800_v47, %v306_v49 }
 0x1f4   :  { %v311_v52 = vmul.f32 %v2800_v47, %v305_v50 }
 0x1f6   :  { %3039 = vmatprep.mubr.msk.f32.mxu1 %vm291_vm6, %v311_v52 }
 0x1f7   :  { %3040 = vmatmul.mubr.msk.f32.vlgmr.msra.gmra.mxu1 %vm291_vm6, %v312_v51 }
 0x2b7   :  { %v3041_v54 = vpop.f32.mrf.mxu1 }
 0x2b8   :  { %v3507_v55 = vadd.f32 %v3041_v54, %v2801_v53 }
 0x2b9   :  { %v393_v56 = vpop.f32.mrf.mxu1 }
 0x2ba   :  { %v3509_v57 = vadd.f32 %v2801_v53, %v393_v56  ;;  %406 = vrot.lane.b32.xlu0 %v3507_v55, %s3380_s29 }
 0x2bc   :  { %404 = vrot.lane.b32.xlu1 %v3509_v57, %s3380_s29  ;;  %3046 = vmatprep.mubr.msk.f32.mxu0 %vm152_vm3, %v3509_v57 }
 0x2be   :  { %608 = vrot.lane.b32.xlu0 %v3507_v55, %s3381_s30 }
 0x2c0   :  { %606 = vrot.lane.b32.xlu1 %v3509_v57, %s3381_s30 }
 0x2c2   :  { %602 = vrot.lane.b32.xlu0 %v3509_v57, %s3382_s10 }
 0x2c4   :  { %604 = vrot.lane.b32.xlu1 %v3507_v55, %s3382_s10 }
 0x32c   :  { %v407_v58 = vpop.permute.xlu0 %406 }
 0x32d   :  { %3042 = vmatprep.subr.msk.mxu0 %vm152_vm3, %v407_v58 }
 0x32e   :  { %3043 = vmatpush3.xpose.msk.msra.mxu0 %vm152_vm3, %v407_v58  ;;  %v405_v59 = vpop.permute.xlu1 %404 }
 0x32f   :  { %3044 = vmatprep.subr.msk.mxu0 %vm152_vm3, %v405_v59 }
 0x330   :  { %v609_v60 = vpop.permute.xlu0 %608 }
 0x332   :  { %3045 = vmatpush3.xpose.msk.msra.mxu0 %vm152_vm3, %v405_v59  ;;  %v607_v62 = vpop.permute.xlu1 %606 }
 0x333   :  { %3056 = vmatprep.subr.msk.mxu0 %vm152_vm3, %v609_v60 }
 0x334   :  { %v603_v61 = vpop.permute.xlu0 %602 }
 0x335   :  { %3047 = vmatmul.mubr.msk.f32.vlgmr.msra.gmra.mxu0 %vm152_vm3, %v3507_v55 }
 0x336   :  { %3057 = vmatpush3.xpose.msk.msra.mxu0 %vm152_vm3, %v609_v60  ;;  %3060 = vmatprep.mubr.msk.f32.mxu0 %vm152_vm3, %v603_v61  ;;  %v605_v63 = vpop.permute.xlu1 %604 }
 0x337   :  { %3058 = vmatprep.subr.msk.mxu0 %vm152_vm3, %v607_v62 }
 0x33a   :  { %3059 = vmatpush3.xpose.msk.msra.mxu0 %vm152_vm3, %v607_v62 }
 0x33d   :  { %3061 = vmatmul.mubr.msk.f32.vlgmr.msra.gmra.mxu0 %vm152_vm3, %v605_v63 }
 0x3f5   :  { %v3048_v9 = vpop.f32.mrf.mxu0 }
 0x3f6   :  { %v492_v12 = vsel %vm3543_vm13, %v3048_v9, -1e+30 }
 0x3f7   :  { %v482_v13 = vpop.f32.mrf.mxu0  ;;  %v496_v14 = vsel %vm68_vm0, %v492_v12, -inf }
 0x3f8   :  { %v491_v15 = vsel %vm3547_vm14, %v482_v13, -1e+30  ;;  %497 = vmax.xlane.f32.xlu1 %v496_v14 }
 0x3f9   :  { %v493_v11 = vsel %vm68_vm0, %v491_v15, -inf }
 0x3fa   :  { %494 = vmax.xlane.f32.xlu0 %v493_v11 }
 0x3fd   :  { %v3062_v16 = vpop.f32.mrf.mxu0 }
 0x3fe   :  { %v694_v20 = vsel %vm3543_vm13, %v3062_v16, -1e+30 }
 0x3ff   :  { %v684_v17 = vpop.f32.mrf.mxu0  ;;  %v698_v21 = vsel %vm68_vm0, %v694_v20, -inf }
 0x400   :  { %v693_v18 = vsel %vm3547_vm14, %v684_v17, -1e+30 }
 0x401   :  { %v695_v19 = vsel %vm68_vm0, %v693_v18, -inf }
 0x402   :  { %696 = vmax.xlane.f32.xlu0 %v695_v19 }
 0x406   :  { %699 = vmax.xlane.f32.xlu0 %v698_v21 }
 0x409   :  { %517 = vrot.lane.b32.xlu1 %v3507_v55, %s3383_s11 }
 0x40d   :  { %719 = vrot.lane.b32.xlu1 %v3507_v55, %s3384_s12 }
 0x411   :  { %717 = vrot.lane.b32.xlu1 %v3509_v57, %s3384_s12 }
 0x41c   :  { %515 = vrot.lane.b32.xlu0 %v3509_v57, %s3383_s11 }
 0x481   :  { %v498_v22 = vpop.xlane.xlu1 %497 }
 0x482   :  { %v500_v23 = vsub.f32 %v492_v12, %v498_v22 }
 0x483   :  { %v495_v24 = vpop.xlane.xlu0 %494 }
 0x484   :  { %v503_v25 = vmul.f32 1.442695, %v500_v23  ;;  %v499_v26 = vsub.f32 %v491_v15, %v495_v24 }
 0x485   :  { %v518_v27 = vpop.permute.xlu1 %517 }
 0x486   :  { %3260 = vpow2.f32 %v503_v25  ;;  %v501_v28 = vmul.f32 1.442695, %v499_v26  ;;  %3049 = vmatprep.subr.mxu1 %v518_v27 }
 0x487   :  { %3050 = vmatpush3.msra.mxu1 %v518_v27 }
 0x488   :  { %3262 = vpow2.f32 %v501_v28 }
 0x489   :  { %v720_v39 = vpop.permute.xlu1 %719 }
 0x48b   :  { %v697_v29 = vpop.xlane.xlu0 %696 }
 0x48c   :  { %v701_v43 = vsub.f32 %v693_v18, %v697_v29 }
 0x48d   :  { %v718_v47 = vpop.permute.xlu1 %717 }
 0x48e   :  { %v703_v44 = vmul.f32 1.442695, %v701_v43 }
 0x48f   :  { %v700_v32 = vpop.xlane.xlu0 %699 }
 0x490   :  { %v702_v33 = vsub.f32 %v694_v20, %v700_v32 }
 0x492   :  { %v705_v34 = vmul.f32 1.442695, %v702_v33 }
 0x493   :  { %v3261_v35 = vpop.eup %3260  ;;  %v516_v36 = vpop.permute.xlu0 %515 }
 0x494   :  { %3264 = vpow2.f32 %v705_v34  ;;  %3051 = vmatprep.subr.mxu1 %v516_v36  ;;  %v508_v37 = vsel %vm68_vm0, %v3261_v35, 0.0 }
 0x495   :  { %v3263_v38 = vpop.eup %3262  ;;  %509 = vadd.xlane.f32.xlu0 %v508_v37  ;;  %3052 = vmatpush3.msra.mxu1 %v516_v36  ;;  %3266 = vpow2.f32 %v703_v44 }
 0x496   :  { %3063 = vmatprep.subr.mxu1 %v720_v39  ;;  %v505_v40 = vsel %vm68_vm0, %v3263_v38, 0.0 }
 0x497   :  { %506 = vadd.xlane.f32.xlu1 %v505_v40 }
 0x4a1   :  { %v3265_v41 = vpop.eup %3264 }
 0x4a2   :  { %v710_v42 = vsel %vm68_vm0, %v3265_v41, 0.0  ;;  %v3267_v45 = vpop.eup %3266 }
 0x4a3   :  { %711 = vadd.xlane.f32.xlu0 %v710_v42  ;;  %v707_v46 = vsel %vm68_vm0, %v3267_v45, 0.0 }
 0x4a8   :  { %808 = vrot.lane.b32.xlu1 %v3509_v57, %s3385_s13 }
 0x4b9   :  { %810 = vrot.lane.b32.xlu0 %v3507_v55, %s3385_s13 }
 0x4bd   :  { %804 = vrot.lane.b32.xlu0 %v3509_v57, %s3386_s14 }
 0x4cc   :  { %708 = vadd.xlane.f32.xlu1 %v707_v46 }
 0x4dd   :  { %806 = vrot.lane.b32.xlu1 %v3507_v55, %s3386_s14 }
 0x51e   :  { %v510_v48 = vpop.xlane.xlu0 %509 }
 0x51f   :  { %3268 = vrcp.f32 %v510_v48 }
 0x520   :  { %v507_v49 = vpop.xlane.xlu1 %506 }
 0x521   :  { %3270 = vrcp.f32 %v507_v49 }
 0x524   :  { %v809_v58 = vpop.permute.xlu1 %808 }
 0x52c   :  { %v3269_v50 = vpop.eup %3268  ;;  %v712_v52 = vpop.xlane.xlu0 %711 }
 0x52d   :  { %v514_v54 = vmul.f32 %v3269_v50, %v3261_v35  ;;  %3272 = vrcp.f32 %v712_v52 }
 0x52e   :  { %v3271_v51 = vpop.eup %3270 }
 0x52f   :  { %v512_v53 = vmul.f32 %v3271_v51, %v3263_v38 }
 0x530   :  { %v811_v56 = vpop.permute.xlu0 %810 }
 0x531   :  { %3053 = vmatprep.mubr.msk.f32.mxu1 %vm68_vm0, %v512_v53 }
 0x532   :  { %3054 = vmatmul.mubr.msk.f32.vlgmr.msra.gmra.mxu1 %vm68_vm0, %v514_v54 }
 0x533   :  { %3064 = vmatpush3.msra.mxu1 %v720_v39 }
 0x534   :  { %3065 = vmatprep.subr.mxu1 %v718_v47  ;;  %v805_v0 = vpop.permute.xlu0 %804 }
 0x535   :  { %3066 = vmatpush3.msra.mxu1 %v718_v47 }
 0x536   :  { %3070 = vmatprep.subr.msk.mxu1 %vm152_vm3, %v811_v56 }
 0x53a   :  { %v3273_v60 = vpop.eup %3272 }
 0x53b   :  { %v716_v63 = vmul.f32 %v3273_v60, %v3265_v41 }
 0x555   :  { %v709_v59 = vpop.xlane.xlu1 %708 }
 0x556   :  { %3274 = vrcp.f32 %v709_v59 }
 0x559   :  { %v807_v1 = vpop.permute.xlu1 %806 }
 0x563   :  { %v3275_v61 = vpop.eup %3274 }
 0x564   :  { %v714_v62 = vmul.f32 %v3275_v61, %v3267_v45 }
 0x566   :  { %3067 = vmatprep.mubr.msk.f32.mxu1 %vm68_vm0, %v714_v62 }
 0x567   :  { %3068 = vmatmul.mubr.msk.f32.vlgmr.msra.gmra.mxu1 %vm68_vm0, %v716_v63 }
 0x568   :  { %3071 = vmatpush3.xpose.msk.msra.mxu1 %vm152_vm3, %v811_v56  ;;  %3074 = vmatprep.mubr.msk.f32.mxu1 %vm152_vm3, %v805_v0 }
 0x569   :  { %3072 = vmatprep.subr.msk.mxu1 %vm152_vm3, %v809_v58 }
 0x56c   :  { %3073 = vmatpush3.xpose.msk.msra.mxu1 %vm152_vm3, %v809_v58 }
 0x56f   :  { %3075 = vmatmul.mubr.msk.f32.vlgmr.msra.gmra.mxu1 %vm152_vm3, %v807_v1 }
 0x5f2   :  { %v3593_v2 = vpop.f32.mrf.mxu1 }
 0x5f4   :  { %v3595_v3 = vpop.f32.mrf.mxu1 }
 0x627   :  { %v3597_v4 = vpop.f32.mrf.mxu1 }
 0x629   :  { %v3599_v5 = vpop.f32.mrf.mxu1 }
 0x62f   :  { %v3076_v6 = vpop.f32.mrf.mxu1 }
 0x630   :  { %v896_v7 = vsel %vm3543_vm13, %v3076_v6, -1e+30 }
 0x631   :  { %v886_v9 = vpop.f32.mrf.mxu1  ;;  %v900_v12 = vsel %vm68_vm0, %v896_v7, -inf }
 0x632   :  { %v895_v13 = vsel %vm3547_vm14, %v886_v9, -1e+30  ;;  %901 = vmax.xlane.f32.xlu1 %v900_v12 }
 0x633   :  { %v897_v14 = vsel %vm68_vm0, %v895_v13, -inf }
 0x634   :  { %898 = vmax.xlane.f32.xlu0 %v897_v14 }
 0x643   :  { %921 = vrot.lane.b32.xlu1 %v3507_v55, %s3387_s15 }
 0x647   :  { %1012 = vrot.lane.b32.xlu1 %v3507_v55, %s3388_s16 }
 0x64b   :  { %1010 = vrot.lane.b32.xlu1 %v3509_v57, %s3388_s16 }
 0x64f   :  { %1008 = vrot.lane.b32.xlu1 %v3507_v55, %s3389_s17 }
 0x6bb   :  { %v902_v15 = vpop.xlane.xlu1 %901 }
 0x6bc   :  { %v904_v11 = vsub.f32 %v896_v7, %v902_v15 }
 0x6bd   :  { %v899_v16 = vpop.xlane.xlu0 %898 }
 0x6be   :  { %v907_v17 = vmul.f32 1.442695, %v904_v11  ;;  %v903_v18 = vsub.f32 %v895_v13, %v899_v16 }
 0x6bf   :  { %v922_v19 = vpop.permute.xlu1 %921 }
 0x6c0   :  { %3276 = vpow2.f32 %v907_v17  ;;  %v905_v20 = vmul.f32 1.442695, %v903_v18  ;;  %3077 = vmatprep.subr.mxu0 %v922_v19 }
 0x6c1   :  { %3078 = vmatpush3.msra.mxu0 %v922_v19 }
 0x6c2   :  { %3278 = vpow2.f32 %v905_v20 }
 0x6c3   :  { %v1013_v28 = vpop.permute.xlu1 %1012 }
 0x6c7   :  { %v1011_v36 = vpop.permute.xlu1 %1010 }
 0x6cb   :  { %v1009_v37 = vpop.permute.xlu1 %1008 }
 0x6cd   :  { %v3277_v21 = vpop.eup %3276 }
 0x6ce   :  { %v912_v22 = vsel %vm68_vm0, %v3277_v21, 0.0 }
 0x6cf   :  { %v3279_v23 = vpop.eup %3278  ;;  %913 = vadd.xlane.f32.xlu0 %v912_v22  ;;  %v1264_v22 = vld [vmem:[%s3995_s6 + $0x8] sm:$0xff] }
 0x6d0   :  { %v909_v24 = vsel %vm68_vm0, %v3279_v23, 0.0 }
 0x6d3   :  { %910 = vadd.xlane.f32.xlu0 %v909_v24 }
 0x6e9   :  { %919 = vrot.lane.b32.xlu0 %v3509_v57, %s3387_s15 }
 0x6ed   :  { %1006 = vrot.lane.b32.xlu0 %v3509_v57, %s3389_s17 }
 0x758   :  { %v914_v25 = vpop.xlane.xlu0 %913 }
 0x759   :  { %3280 = vrcp.f32 %v914_v25 }
 0x75c   :  { %v911_v26 = vpop.xlane.xlu0 %910 }
 0x75d   :  { %3282 = vrcp.f32 %v911_v26 }
 0x760   :  { %v920_v27 = vpop.permute.xlu0 %919 }
 0x761   :  { %3079 = vmatprep.subr.mxu0 %v920_v27 }
 0x762   :  { %3080 = vmatpush3.msra.mxu0 %v920_v27 }
 0x763   :  { %3084 = vmatprep.subr.msk.mxu0 %vm152_vm3, %v1013_v28 }
 0x764   :  { %v1007_v35 = vpop.permute.xlu0 %1006 }
 0x766   :  { %v3281_v29 = vpop.eup %3280 }
 0x767   :  { %v918_v34 = vmul.f32 %v3281_v29, %v3277_v21 }
 0x76a   :  { %v3283_v32 = vpop.eup %3282 }
 0x76b   :  { %v916_v33 = vmul.f32 %v3283_v32, %v3279_v23  ;;  %v1263_v23 = vld [vmem:[%s3995_s6] sm:$0xff] }
 0x76d   :  { %3081 = vmatprep.mubr.msk.f32.mxu0 %vm68_vm0, %v916_v33 }
 0x76e   :  { %3082 = vmatmul.mubr.msk.f32.vlgmr.msra.gmra.mxu0 %vm68_vm0, %v918_v34 }
 0x76f   :  { %3085 = vmatpush3.xpose.msk.msra.mxu0 %vm152_vm3, %v1013_v28  ;;  %3088 = vmatprep.mubr.msk.f32.mxu0 %vm152_vm3, %v1007_v35  ;;  %v2828_v35 = vld [vmem:[%s3993_s4 + $0x2] ss:$0 sm:$0xff] }
 0x770   :  { %3086 = vmatprep.subr.msk.mxu0 %vm152_vm3, %v1011_v36 }
 0x773   :  { %3087 = vmatpush3.xpose.msk.msra.mxu0 %vm152_vm3, %v1011_v36 }
 0x776   :  { %3089 = vmatmul.mubr.msk.f32.vlgmr.msra.gmra.mxu0 %vm152_vm3, %v1009_v37 }
 0x82e   :  { %v3083_v38 = vpop.f32.mrf.mxu0 }
 0x830   :  { %v997_v39 = vpop.f32.mrf.mxu0 }
 0x836   :  { %v3090_v40 = vpop.f32.mrf.mxu0 }
 0x837   :  { %v1098_v41 = vsel %vm3543_vm13, %v3090_v40, -1e+30  ;;  %v1382_v40 = vld [vmem:[%s3996_s7 + $0x30] sm:$0xff] }
 0x838   :  { %v1088_v42 = vpop.f32.mrf.mxu0  ;;  %v1102_v43 = vsel %vm68_vm0, %v1098_v41, -inf }
 0x839   :  { %v1097_v44 = vsel %vm3547_vm14, %v1088_v42, -1e+30  ;;  %1103 = vmax.xlane.f32.xlu1 %v1102_v43  ;;  %v1380_v42 = vld [vmem:[%s3996_s7 + $0x20] sm:$0xff]  ;;  %v1379_v43 = vld [vmem:[%s3996_s7 + $0x18] sm:$0xff] }
 0x83a   :  { %v1099_v45 = vsel %vm68_vm0, %v1097_v44, -inf }
 0x83b   :  { %1100 = vmax.xlane.f32.xlu0 %v1099_v45  ;;  %v1377_v45 = vld [vmem:[%s3996_s7 + $0x8] sm:$0xff] }
 0x84a   :  { %1123 = vrot.lane.b32.xlu1 %v3507_v55, %s3390_s18 }
 0x84e   :  { %1210 = vrot.lane.b32.xlu1 %v3599_v5, %s3391_s0 }
 0x852   :  { %1212 = vrot.lane.b32.xlu1 %v3597_v4, %s3391_s0 }
 0x856   :  { %1220 = vrot.lane.b32.xlu1 %v3083_v38, %s3392_s19 }
 0x8c2   :  { %v1104_v46 = vpop.xlane.xlu1 %1103 }
 0x8c3   :  { %v1106_v47 = vsub.f32 %v1098_v41, %v1104_v46  ;;  %v1381_v41 = vld [vmem:[%s3996_s7 + $0x28] sm:$0xff]  ;;  %v1376_v46 = vld [vmem:[%s3996_s7] sm:$0xff] }
 0x8c4   :  { %v1101_v48 = vpop.xlane.xlu0 %1100 }
 0x8c5   :  { %v1109_v49 = vmul.f32 1.442695, %v1106_v47  ;;  %v1105_v50 = vsub.f32 %v1097_v44, %v1101_v48  ;;  %v1378_v44 = vld [vmem:[%s3996_s7 + $0x10] sm:$0xff]  ;;  %v2829_v47 = vld [vmem:[%s3993_s4 + $0x3] ss:$0 sm:$0xff] }
 0x8c6   :  { %v1124_v51 = vpop.permute.xlu1 %1123 }
 0x8c7   :  { %3284 = vpow2.f32 %v1109_v49  ;;  %v1107_v52 = vmul.f32 1.442695, %v1105_v50  ;;  %3091 = vmatprep.subr.mxu1 %v1124_v51 }
 0x8c8   :  { %3092 = vmatpush3.msra.mxu1 %v1124_v51 }
 0x8c9   :  { %3286 = vpow2.f32 %v1107_v52 }
 0x8ca   :  { %v1211_v4 = vpop.permute.xlu1 %1210 }
 0x8cb   :  { %v1232_v14 = vsel %vm152_vm3, %v3595_v3, %v1211_v4  ;;  %v2834_v4 = vld [vmem:[%s3993_s4 + $0x4] ss:$0 sm:$0xff] }
 0x8ce   :  { %v1213_v5 = vpop.permute.xlu1 %1212 }
 0x8cf   :  { %v1233_v9 = vsel %vm152_vm3, %v3593_v2, %v1213_v5 }
 0x8d2   :  { %v1221_v6 = vpop.permute.xlu1 %1220 }
 0x8d3   :  { %v1235_v12 = vsel %vm68_vm0, %v1233_v9, %v1221_v6 }
 0x8d4   :  { %v3285_v55 = vpop.eup %3284 }
 0x8d5   :  { %v1114_v53 = vsel %vm68_vm0, %v3285_v55, 0.0 }
 0x8d6   :  { %v3287_v54 = vpop.eup %3286  ;;  %1115 = vadd.xlane.f32.xlu0 %v1114_v53 }
 0x8d7   :  { %v1111_v56 = vsel %vm68_vm0, %v3287_v54, 0.0 }
 0x8da   :  { %1112 = vadd.xlane.f32.xlu0 %v1111_v56 }
 0x8f0   :  { %1121 = vrot.lane.b32.xlu0 %v3509_v57, %s3390_s18 }
 0x8f4   :  { %1218 = vrot.lane.b32.xlu0 %v997_v39, %s3392_s19  ;;  %v1383_v39 = vld [vmem:[%s3996_s7 + $0x38] sm:$0xff] }
 0x8f5   :  { %3109 = vmatprep.subr.mxu0 %v1383_v39 }
 0x8f6   :  { %3110 = vmatpush3.msra.mxu0 %v1383_v39 }
 0x8f7   :  { %3111 = vmatprep.subr.mxu0 %v1382_v40 }
 0x8f8   :  { %3112 = vmatpush3.msra.mxu0 %v1382_v40 }
 0x8f9   :  { %3113 = vmatprep.subr.mxu0 %v1381_v41 }
 0x8fa   :  { %3114 = vmatpush3.msra.mxu0 %v1381_v41 }
 0x8fb   :  { %3115 = vmatprep.subr.mxu0 %v1380_v42 }
 0x8fc   :  { %3116 = vmatpush3.msra.mxu0 %v1380_v42 }
 0x8fd   :  { %3117 = vmatprep.subr.mxu0 %v1379_v43 }
 0x8fe   :  { %3118 = vmatpush3.msra.mxu0 %v1379_v43 }
 0x8ff   :  { %3119 = vmatprep.subr.mxu0 %v1378_v44 }
 0x900   :  { %3120 = vmatpush3.msra.mxu0 %v1378_v44 }
 0x901   :  { %3121 = vmatprep.subr.mxu0 %v1377_v45 }
 0x902   :  { %3122 = vmatpush3.msra.mxu0 %v1377_v45 }
 0x903   :  { %3123 = vmatprep.subr.mxu0 %v1376_v46 }
 0x904   :  { %3124 = vmatpush3.msra.mxu0 %v1376_v46 }
 0x95f   :  { %v1116_v58 = vpop.xlane.xlu0 %1115 }
 0x960   :  { %3288 = vrcp.f32 %v1116_v58 }
 0x963   :  { %v1113_v59 = vpop.xlane.xlu0 %1112 }
 0x964   :  { %3290 = vrcp.f32 %v1113_v59 }
 0x967   :  { %v1122_v60 = vpop.permute.xlu0 %1121 }
 0x968   :  { %3093 = vmatprep.subr.mxu1 %v1122_v60 }
 0x969   :  { %3094 = vmatpush3.msra.mxu1 %v1122_v60 }
 0x96b   :  { %v1219_v7 = vpop.permute.xlu0 %1218 }
 0x96c   :  { %v1234_v11 = vsel %vm68_vm0, %v1232_v14, %v1219_v7 }
 0x96d   :  { %v3289_v61 = vpop.eup %3288 }
 0x96e   :  { %v1120_v0 = vmul.f32 %v3289_v61, %v3285_v55 }
 0x971   :  { %v3291_v62 = vpop.eup %3290 }
 0x972   :  { %v1118_v63 = vmul.f32 %v3291_v62, %v3287_v54 }
 0x974   :  { %3095 = vmatprep.mubr.msk.f32.mxu1 %vm68_vm0, %v1118_v63 }
 0x975   :  { %3096 = vmatmul.mubr.msk.f32.vlgmr.msra.gmra.mxu1 %vm68_vm0, %v1120_v0 }
 0xa35   :  { %v3097_v1 = vpop.f32.mrf.mxu1 }
 0xa36   :  { %1228 = vrot.lane.b32.xlu1 %v3097_v1, %s3393_s1 }
 0xa37   :  { %v1199_v57 = vpop.f32.mrf.mxu1 }
 0xa38   :  { %1226 = vrot.lane.b32.xlu0 %v1199_v57, %s3393_s1 }
 0xaa8   :  { %v1229_v13 = vpop.permute.xlu1 %1228 }
 0xaa9   :  { %v1238_v15 = vsel %vm1236_vm15, %v1235_v12, %v1229_v13 }
 0xaaa   :  { %v3659_v16 = vadd.f32 %v1238_v15, %v3477_v31  ;;  %v1227_v17 = vpop.permute.xlu0 %1226  ;;  %v1266_v31 = vld [vmem:[%s3995_s6 + $0x18] sm:$0xff] }
 0xaab   :  { %v1237_v18 = vsel %vm1236_vm15, %v1234_v11, %v1227_v17  ;;  %3098 = vmatprep.subr.mxu1 %v1266_v31 }
 0xaac   :  { %v3663_v19 = vadd.f32 %v1237_v18, %v3475_v30  ;;  %v1242_v2 = vmul.f32 %v3659_v16, %v3659_v16  ;;  %v1265_v30 = vld [vmem:[%s3995_s6 + $0x10] sm:$0xff]  ;;  %3099 = vmatpush3.msra.mxu1 %v1266_v31 }
 0xaad   :  { %3100 = vmatprep.subr.mxu1 %v1265_v30  ;;  %v2840_v18 = vld [vmem:[%s3994_s5 + $0x30] sm:$0xff] }
 0xaae   :  { %v1246_v20 = vsel %vm291_vm6, %v1242_v2, 0.0  ;;  %v1241_v3 = vmul.f32 %v3663_v19, %v3663_v19  ;;  %3101 = vmatpush3.msra.mxu1 %v1265_v30  ;;  %v2838_v2 = vld [vmem:[%s3994_s5 + $0x20] sm:$0xff] }
 0xaaf   :  { %1247 = vadd.xlane.f32.xlu1 %v1246_v20  ;;  %3102 = vmatprep.subr.mxu1 %v1264_v22 }
 0xab0   :  { %v1243_v21 = vsel %vm291_vm6, %v1241_v3, 0.0  ;;  %3103 = vmatpush3.msra.mxu1 %v1264_v22 }
 0xab1   :  { %1244 = vadd.xlane.f32.xlu0 %v1243_v21  ;;  %3104 = vmatprep.subr.mxu1 %v1263_v23 }
 0xab2   :  { %3105 = vmatpush3.msra.mxu1 %v1263_v23 }
 0xb38   :  { %v1248_v24 = vpop.xlane.xlu1 %1247 }
 0xb39   :  { %v1250_v25 = vmul.f32 0.03125, %v1248_v24 }
 0xb3a   :  { %v1245_v26 = vpop.xlane.xlu0 %1244 }
 0xb3b   :  { %v1252_v27 = vadd.f32 1e-06, %v1250_v25  ;;  %v1249_v28 = vmul.f32 0.03125, %v1245_v26  ;;  %v2837_v26 = vld [vmem:[%s3993_s4 + $0x5] ss:$0 sm:$0xff] }
 0xb3d   :  { %3292 = vrsqrt.f32 %v1252_v27  ;;  %v1251_v29 = vadd.f32 1e-06, %v1249_v28 }
 0xb3f   :  { %3294 = vrsqrt.f32 %v1251_v29 }
 0xb4a   :  { %v3293_v32 = vpop.eup %3292 }
 0xb4b   :  { %v1256_v34 = vmul.f32 %v3293_v32, %v3659_v16  ;;  %v2842_v32 = vld [vmem:[%s3993_s4 + $0x6] ss:$0 sm:$0xff] }
 0xb4c   :  { %v3295_v33 = vpop.eup %3294 }
 0xb4d   :  { %v1255_v36 = vmul.f32 %v3295_v33, %v3663_v19  ;;  %v1262_v38 = vmul.f32 %v2828_v35, %v1256_v34 }
 0xb4f   :  { %v1261_v37 = vmul.f32 %v2828_v35, %v1255_v36 }
 0xb51   :  { %3106 = vmatprep.mubr.msk.f32.mxu1 %vm291_vm6, %v1261_v37 }
 0xb52   :  { %3107 = vmatmul.mubr.msk.f32.vlgmr.msra.gmra.mxu1 %vm291_vm6, %v1262_v38 }
 0xc12   :  { %v3108_v48 = vpop.f32.mrf.mxu1 }
 0xc13   :  { %v1349_v49 = vadd.f32 %v3108_v48, %v2829_v47 }
 0xc14   :  { %v1343_v50 = vpop.f32.mrf.mxu1 }
 0xc15   :  { %v1344_v51 = vadd.f32 %v2829_v47, %v1343_v50  ;;  %1370 = vrot.lane.b32.xlu1 %v1349_v49, %s3383_s11  ;;  %v2833_v55 = vmul.f32 -1.442695, %v1349_v49 }
 0xc17   :  { %1368 = vrot.lane.b32.xlu0 %v1344_v51, %s3383_s11  ;;  %v2832_v52 = vmul.f32 -1.442695, %v1344_v51 }
 0xc19   :  { %3296 = vpow2.f32 %v2832_v52 }
 0xc1a   :  { %3298 = vpow2.f32 %v2833_v55 }
 0xc26   :  { %v3297_v53 = vpop.eup %3296 }
 0xc27   :  { %v3299_v54 = vpop.eup %3298  ;;  %v1358_v56 = vadd.f32 1.0, %v3297_v53 }
 0xc28   :  { %v1359_v58 = vadd.f32 1.0, %v3299_v54 }
 0xc29   :  { %3300 = vrcp.f32 %v1358_v56 }
 0xc2a   :  { %3302 = vrcp.f32 %v1359_v58 }
 0xc36   :  { %v3301_v59 = vpop.eup %3300 }
 0xc37   :  { %v3303_v60 = vpop.eup %3302  ;;  %v1364_v62 = vmul.f32 %v3301_v59, %v1344_v51 }
 0xc38   :  { %v1365_v63 = vmul.f32 %v3303_v60, %v1349_v49 }
 0xc87   :  { %v1371_v61 = vpop.permute.xlu1 %1370 }
 0xc88   :  { %v1375_v57 = vmul.f32 %v1371_v61, %v1365_v63 }
 0xc89   :  { %v1369_v0 = vpop.permute.xlu0 %1368 }
 0xc8a   :  { %v1374_v1 = vmul.f32 %v1369_v0, %v1364_v62 }
 0xc8c   :  { %3125 = vmatprep.mubr.msk.f32.mxu0 %vm1388_vm1, %v1374_v1 }
 0xc8d   :  { %3126 = vmatmul.mubr.msk.f32.vlgmr.msra.gmra.mxu0 %vm1388_vm1, %v1375_v57 }
 0xd4d   :  { %v3127_v5 = vpop.f32.mrf.mxu0 }
 0xd4e   :  { %v1467_v6 = vadd.f32 %v3127_v5, %v2834_v4 }
 0xd4f   :  { %v1461_v7 = vpop.f32.mrf.mxu0 }
 0xd50   :  { %v3725_v9 = vadd.f32 %v1467_v6, %v3659_v16  ;;  %v1462_v12 = vadd.f32 %v2834_v4, %v1461_v7  ;;  %v2841_v16 = vld [vmem:[%s3994_s5 + $0x38] sm:$0xff] }
 0xd51   :  { %3128 = vmatprep.subr.mxu1 %v2841_v16 }
 0xd52   :  { %v3728_v13 = vadd.f32 %v1462_v12, %v3663_v19  ;;  %v1478_v14 = vmul.f32 %v3725_v9, %v3725_v9  ;;  %3129 = vmatpush3.msra.mxu1 %v2841_v16  ;;  %v2839_v19 = vld [vmem:[%s3994_s5 + $0x28] sm:$0xff] }
 0xd53   :  { %3130 = vmatprep.subr.mxu1 %v2840_v18 }
 0xd54   :  { %v1482_v15 = vsel %vm291_vm6, %v1478_v14, 0.0  ;;  %v1477_v11 = vmul.f32 %v3728_v13, %v3728_v13  ;;  %3131 = vmatpush3.msra.mxu1 %v2840_v18 }
 0xd55   :  { %1483 = vadd.xlane.f32.xlu1 %v1482_v15  ;;  %3132 = vmatprep.subr.mxu1 %v2839_v19 }
 0xd56   :  { %v1479_v17 = vsel %vm291_vm6, %v1477_v11, 0.0  ;;  %3133 = vmatpush3.msra.mxu1 %v2839_v19 }
 0xd57   :  { %1480 = vadd.xlane.f32.xlu0 %v1479_v17  ;;  %3134 = vmatprep.subr.mxu1 %v2838_v2 }
 0xd58   :  { %3135 = vmatpush3.msra.mxu1 %v2838_v2 }
 0xdde   :  { %v1484_v20 = vpop.xlane.xlu1 %1483 }
 0xddf   :  { %v1486_v3 = vmul.f32 0.03125, %v1484_v20 }
 0xde0   :  { %v1481_v21 = vpop.xlane.xlu0 %1480 }
 0xde1   :  { %v1488_v31 = vadd.f32 1e-06, %v1486_v3  ;;  %v1485_v30 = vmul.f32 0.03125, %v1481_v21 }
 0xde3   :  { %3304 = vrsqrt.f32 %v1488_v31  ;;  %v1487_v22 = vadd.f32 1e-06, %v1485_v30 }
 0xde5   :  { %3306 = vrsqrt.f32 %v1487_v22 }
 0xdf0   :  { %v3305_v23 = vpop.eup %3304 }
 0xdf1   :  { %v1492_v25 = vmul.f32 %v3305_v23, %v3725_v9 }
 0xdf2   :  { %v3307_v24 = vpop.eup %3306 }
 0xdf3   :  { %v1491_v27 = vmul.f32 %v3307_v24, %v3728_v13  ;;  %v1498_v29 = vmul.f32 %v2837_v26, %v1492_v25 }
 0xdf5   :  { %v1497_v28 = vmul.f32 %v2837_v26, %v1491_v27 }
 0xdf7   :  { %3136 = vmatprep.mubr.msk.f32.mxu1 %vm291_vm6, %v1497_v28 }
 0xdf8   :  { %3137 = vmatmul.mubr.msk.f32.vlgmr.msra.gmra.mxu1 %vm291_vm6, %v1498_v29 }
 0xeb8   :  { %v3138_v33 = vpop.f32.mrf.mxu1 }
 0xeb9   :  { %v3758_v34 = vadd.f32 %v3138_v33, %v2842_v32 }
 0xeba   :  { %v1580_v35 = vpop.f32.mrf.mxu1 }
 0xebb   :  { %v3760_v36 = vadd.f32 %v2842_v32, %v1580_v35  ;;  %1593 = vrot.lane.b32.xlu0 %v3758_v34, %s3380_s29 }
 0xebd   :  { %1591 = vrot.lane.b32.xlu1 %v3760_v36, %s3380_s29  ;;  %3143 = vmatprep.mubr.msk.f32.mxu1 %vm152_vm3, %v3760_v36 }
 0xf2d   :  { %v1594_v37 = vpop.permute.xlu0 %1593 }
 0xf2e   :  { %3139 = vmatprep.subr.msk.mxu1 %vm152_vm3, %v1594_v37 }
 0xf2f   :  { %3140 = vmatpush3.xpose.msk.msra.mxu1 %vm152_vm3, %v1594_v37  ;;  %v1592_v38 = vpop.permute.xlu1 %1591 }
 0xf30   :  { %3141 = vmatprep.subr.msk.mxu1 %vm152_vm3, %v1592_v38 }
 0xf33   :  { %3142 = vmatpush3.xpose.msk.msra.mxu1 %vm152_vm3, %v1592_v38 }
 0xf36   :  { %3144 = vmatmul.mubr.msk.f32.vlgmr.msra.gmra.mxu1 %vm152_vm3, %v3758_v34 }
 0xff6   :  { %v3145_v39 = vpop.f32.mrf.mxu1 }
 0xff7   :  { %v1679_v40 = vsel %vm3543_vm13, %v3145_v39, -1e+30 }
 0xff8   :  { %v1669_v41 = vpop.f32.mrf.mxu1  ;;  %v1683_v42 = vsel %vm68_vm0, %v1679_v40, -inf }
 0xff9   :  { %v1678_v43 = vsel %vm3547_vm14, %v1669_v41, -1e+30  ;;  %1684 = vmax.xlane.f32.xlu1 %v1683_v42 }
 0xffa   :  { %v1680_v44 = vsel %vm68_vm0, %v1678_v43, -inf }
 0xffb   :  { %1681 = vmax.xlane.f32.xlu0 %v1680_v44 }
0x100a   :  { %1704 = vrot.lane.b32.xlu1 %v3758_v34, %s3383_s11 }
0x100e   :  { %1795 = vrot.lane.b32.xlu1 %v3758_v34, %s3381_s30 }
0x1012   :  { %1793 = vrot.lane.b32.xlu1 %v3760_v36, %s3381_s30 }
0x1016   :  { %1791 = vrot.lane.b32.xlu1 %v3758_v34, %s3382_s10 }
0x1082   :  { %v1685_v45 = vpop.xlane.xlu1 %1684 }
0x1083   :  { %v1687_v46 = vsub.f32 %v1679_v40, %v1685_v45 }
0x1084   :  { %v1682_v47 = vpop.xlane.xlu0 %1681 }
0x1085   :  { %v1690_v48 = vmul.f32 1.442695, %v1687_v46  ;;  %v1686_v49 = vsub.f32 %v1678_v43, %v1682_v47 }
0x1086   :  { %v1705_v50 = vpop.permute.xlu1 %1704 }
0x1087   :  { %3308 = vpow2.f32 %v1690_v48  ;;  %v1688_v51 = vmul.f32 1.442695, %v1686_v49  ;;  %3146 = vmatprep.subr.mxu0 %v1705_v50 }
0x1088   :  { %3147 = vmatpush3.msra.mxu0 %v1705_v50 }
0x1089   :  { %3310 = vpow2.f32 %v1688_v51 }
0x108a   :  { %v1796_v60 = vpop.permute.xlu1 %1795 }
0x108e   :  { %v1794_v57 = vpop.permute.xlu1 %1793 }
0x1092   :  { %v1792_v4 = vpop.permute.xlu1 %1791 }
0x1094   :  { %v3309_v52 = vpop.eup %3308 }
0x1095   :  { %v1695_v55 = vsel %vm68_vm0, %v3309_v52, 0.0 }
0x1096   :  { %v3311_v53 = vpop.eup %3310  ;;  %1696 = vadd.xlane.f32.xlu0 %v1695_v55 }
0x1097   :  { %v1692_v54 = vsel %vm68_vm0, %v3311_v53, 0.0 }
0x109a   :  { %1693 = vadd.xlane.f32.xlu0 %v1692_v54 }
0x10b0   :  { %1702 = vrot.lane.b32.xlu0 %v3760_v36, %s3383_s11 }
0x10b4   :  { %1789 = vrot.lane.b32.xlu0 %v3760_v36, %s3382_s10 }
0x111f   :  { %v1697_v56 = vpop.xlane.xlu0 %1696 }
0x1120   :  { %3312 = vrcp.f32 %v1697_v56 }
0x1123   :  { %v1694_v58 = vpop.xlane.xlu0 %1693 }
0x1124   :  { %3314 = vrcp.f32 %v1694_v58 }
0x1127   :  { %v1703_v59 = vpop.permute.xlu0 %1702 }
0x1128   :  { %3148 = vmatprep.subr.mxu0 %v1703_v59 }
0x1129   :  { %3149 = vmatpush3.msra.mxu0 %v1703_v59 }
0x112a   :  { %3153 = vmatprep.subr.msk.mxu0 %vm152_vm3, %v1796_v60 }
0x112b   :  { %v1790_v1 = vpop.permute.xlu0 %1789 }
0x112d   :  { %v3313_v61 = vpop.eup %3312 }
0x112e   :  { %v1701_v0 = vmul.f32 %v3313_v61, %v3309_v52 }
0x1131   :  { %v3315_v62 = vpop.eup %3314 }
0x1132   :  { %v1699_v63 = vmul.f32 %v3315_v62, %v3311_v53 }
0x1134   :  { %3150 = vmatprep.mubr.msk.f32.mxu0 %vm68_vm0, %v1699_v63 }
0x1135   :  { %3151 = vmatmul.mubr.msk.f32.vlgmr.msra.gmra.mxu0 %vm68_vm0, %v1701_v0 }
0x1136   :  { %3154 = vmatpush3.xpose.msk.msra.mxu0 %vm152_vm3, %v1796_v60  ;;  %3157 = vmatprep.mubr.msk.f32.mxu0 %vm152_vm3, %v1790_v1 }
0x1137   :  { %3155 = vmatprep.subr.msk.mxu0 %vm152_vm3, %v1794_v57 }
0x113a   :  { %3156 = vmatpush3.xpose.msk.msra.mxu0 %vm152_vm3, %v1794_v57 }
0x113d   :  { %3158 = vmatmul.mubr.msk.f32.vlgmr.msra.gmra.mxu0 %vm152_vm3, %v1792_v4 }
0x11f5   :  { %v3802_v5 = vpop.f32.mrf.mxu0 }
0x11f7   :  { %v3804_v6 = vpop.f32.mrf.mxu0 }
0x11fd   :  { %v3159_v7 = vpop.f32.mrf.mxu0 }
0x11fe   :  { %v1881_v12 = vsel %vm3543_vm13, %v3159_v7, -1e+30 }
0x11ff   :  { %v1871_v14 = vpop.f32.mrf.mxu0  ;;  %v1885_v15 = vsel %vm68_vm0, %v1881_v12, -inf }
0x1200   :  { %v1880_v11 = vsel %vm3547_vm14, %v1871_v14, -1e+30  ;;  %1886 = vmax.xlane.f32.xlu1 %v1885_v15 }
0x1201   :  { %v1882_v17 = vsel %vm68_vm0, %v1880_v11, -inf }
0x1202   :  { %1883 = vmax.xlane.f32.xlu0 %v1882_v17 }
0x1211   :  { %1906 = vrot.lane.b32.xlu1 %v3758_v34, %s3384_s12 }
0x1215   :  { %1997 = vrot.lane.b32.xlu1 %v3758_v34, %s3385_s13 }
0x1219   :  { %1995 = vrot.lane.b32.xlu1 %v3760_v36, %s3385_s13 }
0x121d   :  { %1993 = vrot.lane.b32.xlu1 %v3758_v34, %s3386_s14 }
0x1289   :  { %v1887_v16 = vpop.xlane.xlu1 %1886 }
0x128a   :  { %v1889_v18 = vsub.f32 %v1881_v12, %v1887_v16 }
0x128b   :  { %v1884_v19 = vpop.xlane.xlu0 %1883 }
0x128c   :  { %v1892_v2 = vmul.f32 1.442695, %v1889_v18  ;;  %v1888_v20 = vsub.f32 %v1880_v11, %v1884_v19 }
0x128d   :  { %v1907_v3 = vpop.permute.xlu1 %1906 }
0x128e   :  { %3316 = vpow2.f32 %v1892_v2  ;;  %v1890_v21 = vmul.f32 1.442695, %v1888_v20  ;;  %3160 = vmatprep.subr.mxu1 %v1907_v3 }
0x128f   :  { %3161 = vmatpush3.msra.mxu1 %v1907_v3 }
0x1290   :  { %3318 = vpow2.f32 %v1890_v21 }
0x1291   :  { %v1998_v27 = vpop.permute.xlu1 %1997 }
0x1295   :  { %v1996_v37 = vpop.permute.xlu1 %1995 }
0x1299   :  { %v1994_v38 = vpop.permute.xlu1 %1993 }
0x129b   :  { %v3317_v31 = vpop.eup %3316 }
0x129c   :  { %v1897_v30 = vsel %vm68_vm0, %v3317_v31, 0.0 }
0x129d   :  { %v3319_v22 = vpop.eup %3318  ;;  %1898 = vadd.xlane.f32.xlu0 %v1897_v30 }
0x129e   :  { %v1894_v23 = vsel %vm68_vm0, %v3319_v22, 0.0 }
0x12a1   :  { %1895 = vadd.xlane.f32.xlu0 %v1894_v23 }
0x12b7   :  { %1904 = vrot.lane.b32.xlu0 %v3760_v36, %s3384_s12 }
0x12bb   :  { %1991 = vrot.lane.b32.xlu0 %v3760_v36, %s3386_s14 }
0x1326   :  { %v1899_v24 = vpop.xlane.xlu0 %1898 }
0x1327   :  { %3320 = vrcp.f32 %v1899_v24 }
0x132a   :  { %v1896_v25 = vpop.xlane.xlu0 %1895 }
0x132b   :  { %3322 = vrcp.f32 %v1896_v25 }
0x132e   :  { %v1905_v26 = vpop.permute.xlu0 %1904 }
0x132f   :  { %3162 = vmatprep.subr.mxu1 %v1905_v26 }
0x1330   :  { %3163 = vmatpush3.msra.mxu1 %v1905_v26 }
0x1331   :  { %3167 = vmatprep.subr.msk.mxu1 %vm152_vm3, %v1998_v27 }
0x1332   :  { %v1992_v35 = vpop.permute.xlu0 %1991 }
0x1334   :  { %v3321_v28 = vpop.eup %3320 }
0x1335   :  { %v1903_v33 = vmul.f32 %v3321_v28, %v3317_v31 }
0x1338   :  { %v3323_v29 = vpop.eup %3322 }
0x1339   :  { %v1901_v32 = vmul.f32 %v3323_v29, %v3319_v22 }
0x133b   :  { %3164 = vmatprep.mubr.msk.f32.mxu1 %vm68_vm0, %v1901_v32 }
0x133c   :  { %3165 = vmatmul.mubr.msk.f32.vlgmr.msra.gmra.mxu1 %vm68_vm0, %v1903_v33 }
0x133d   :  { %3168 = vmatpush3.xpose.msk.msra.mxu1 %vm152_vm3, %v1998_v27  ;;  %3171 = vmatprep.mubr.msk.f32.mxu1 %vm152_vm3, %v1992_v35 }
0x133e   :  { %3169 = vmatprep.subr.msk.mxu1 %vm152_vm3, %v1996_v37 }
0x1341   :  { %3170 = vmatpush3.xpose.msk.msra.mxu1 %vm152_vm3, %v1996_v37 }
0x1344   :  { %3172 = vmatmul.mubr.msk.f32.vlgmr.msra.gmra.mxu1 %vm152_vm3, %v1994_v38 }
0x13fc   :  { %v3834_v39 = vpop.f32.mrf.mxu1 }
0x13fe   :  { %v3836_v40 = vpop.f32.mrf.mxu1 }
0x1404   :  { %v3173_v41 = vpop.f32.mrf.mxu1 }
0x1405   :  { %v2083_v42 = vsel %vm3543_vm13, %v3173_v41, -1e+30 }
0x1406   :  { %v2073_v43 = vpop.f32.mrf.mxu1  ;;  %v2087_v44 = vsel %vm68_vm0, %v2083_v42, -inf }
0x1407   :  { %v2082_v45 = vsel %vm3547_vm14, %v2073_v43, -1e+30  ;;  %2088 = vmax.xlane.f32.xlu1 %v2087_v44 }
0x1408   :  { %v2084_v46 = vsel %vm68_vm0, %v2082_v45, -inf }
0x1409   :  { %2085 = vmax.xlane.f32.xlu0 %v2084_v46 }
0x1418   :  { %2108 = vrot.lane.b32.xlu1 %v3758_v34, %s3387_s15 }
0x141c   :  { %2199 = vrot.lane.b32.xlu1 %v3758_v34, %s3388_s16 }
0x1420   :  { %2197 = vrot.lane.b32.xlu1 %v3760_v36, %s3388_s16 }
0x1424   :  { %2195 = vrot.lane.b32.xlu1 %v3758_v34, %s3389_s17 }
0x1490   :  { %v2089_v47 = vpop.xlane.xlu1 %2088 }
0x1491   :  { %v2091_v48 = vsub.f32 %v2083_v42, %v2089_v47 }
0x1492   :  { %v2086_v49 = vpop.xlane.xlu0 %2085 }
0x1493   :  { %v2094_v50 = vmul.f32 1.442695, %v2091_v48  ;;  %v2090_v51 = vsub.f32 %v2082_v45, %v2086_v49 }
0x1494   :  { %v2109_v52 = vpop.permute.xlu1 %2108 }
0x1495   :  { %3324 = vpow2.f32 %v2094_v50  ;;  %v2092_v55 = vmul.f32 1.442695, %v2090_v51  ;;  %3174 = vmatprep.subr.mxu0 %v2109_v52 }
0x1496   :  { %3175 = vmatpush3.msra.mxu0 %v2109_v52 }
0x1497   :  { %3326 = vpow2.f32 %v2092_v55  ;;  %v2871_v55 = vld [vmem:[%s3995_s6 + $0x28] sm:$0xff] }
0x1498   :  { %v2200_v62 = vpop.permute.xlu1 %2199 }
0x149c   :  { %v2198_v7 = vpop.permute.xlu1 %2197 }
0x14a0   :  { %v2196_v12 = vpop.permute.xlu1 %2195 }
0x14a2   :  { %v3325_v53 = vpop.eup %3324 }
0x14a3   :  { %v2099_v54 = vsel %vm68_vm0, %v3325_v53, 0.0 }
0x14a4   :  { %v3327_v56 = vpop.eup %3326  ;;  %2100 = vadd.xlane.f32.xlu0 %v2099_v54 }
0x14a5   :  { %v2096_v58 = vsel %vm68_vm0, %v3327_v56, 0.0 }
0x14a8   :  { %2097 = vadd.xlane.f32.xlu0 %v2096_v58 }
0x14be   :  { %2106 = vrot.lane.b32.xlu0 %v3760_v36, %s3387_s15 }
0x14c2   :  { %2193 = vrot.lane.b32.xlu0 %v3760_v36, %s3389_s17 }
0x152d   :  { %v2101_v59 = vpop.xlane.xlu0 %2100 }
0x152e   :  { %3328 = vrcp.f32 %v2101_v59 }
0x1531   :  { %v2098_v60 = vpop.xlane.xlu0 %2097 }
0x1532   :  { %3330 = vrcp.f32 %v2098_v60 }
0x1535   :  { %v2107_v61 = vpop.permute.xlu0 %2106 }
0x1536   :  { %3176 = vmatprep.subr.mxu0 %v2107_v61 }
0x1537   :  { %3177 = vmatpush3.msra.mxu0 %v2107_v61 }
0x1538   :  { %3181 = vmatprep.subr.msk.mxu0 %vm152_vm3, %v2200_v62 }
0x1539   :  { %v2194_v4 = vpop.permute.xlu0 %2193 }
0x153b   :  { %v3329_v63 = vpop.eup %3328 }
0x153c   :  { %v2105_v57 = vmul.f32 %v3329_v63, %v3325_v53  ;;  %v2870_v53 = vld [vmem:[%s3995_s6 + $0x20] sm:$0xff] }
0x153f   :  { %v3331_v0 = vpop.eup %3330 }
0x1540   :  { %v2103_v1 = vmul.f32 %v3331_v0, %v3327_v56 }
0x1542   :  { %3178 = vmatprep.mubr.msk.f32.mxu0 %vm68_vm0, %v2103_v1  ;;  %v2869_v1 = vld [vmem:[%s3993_s4 + $0x7] ss:$0 sm:$0xff] }
0x1543   :  { %3179 = vmatmul.mubr.msk.f32.vlgmr.msra.gmra.mxu0 %vm68_vm0, %v2105_v57 }
0x1544   :  { %3182 = vmatpush3.xpose.msk.msra.mxu0 %vm152_vm3, %v2200_v62  ;;  %3185 = vmatprep.mubr.msk.f32.mxu0 %vm152_vm3, %v2194_v4 }
0x1545   :  { %3183 = vmatprep.subr.msk.mxu0 %vm152_vm3, %v2198_v7 }
0x1548   :  { %3184 = vmatpush3.xpose.msk.msra.mxu0 %vm152_vm3, %v2198_v7 }
0x154b   :  { %3186 = vmatmul.mubr.msk.f32.vlgmr.msra.gmra.mxu0 %vm152_vm3, %v2196_v12  ;;  %v2886_v12 = vld [vmem:[%s3996_s7 + $0x78] sm:$0xff] }
0x154c   :  { %3206 = vmatprep.subr.mxu0 %v2886_v12 }
0x154d   :  { %3207 = vmatpush3.msra.mxu0 %v2886_v12 }
0x1603   :  { %v3180_v14 = vpop.f32.mrf.mxu0 }
0x1605   :  { %v2184_v15 = vpop.f32.mrf.mxu0 }
0x160b   :  { %v3187_v11 = vpop.f32.mrf.mxu0 }
0x160c   :  { %v2285_v17 = vsel %vm3543_vm13, %v3187_v11, -1e+30  ;;  %v2883_v11 = vld [vmem:[%s3996_s7 + $0x60] sm:$0xff] }
0x160d   :  { %v2275_v16 = vpop.f32.mrf.mxu0  ;;  %v2289_v18 = vsel %vm68_vm0, %v2285_v17, -inf }
0x160e   :  { %v2284_v19 = vsel %vm3547_vm14, %v2275_v16, -1e+30  ;;  %2290 = vmax.xlane.f32.xlu1 %v2289_v18  ;;  %v2881_v16 = vld [vmem:[%s3996_s7 + $0x50] sm:$0xff]  ;;  %v2880_v18 = vld [vmem:[%s3996_s7 + $0x48] sm:$0xff] }
0x160f   :  { %v2286_v2 = vsel %vm68_vm0, %v2284_v19, -inf }
0x1610   :  { %2287 = vmax.xlane.f32.xlu0 %v2286_v2  ;;  %v2874_v2 = vld [vmem:[%s3993_s4 + $0x8] ss:$0 sm:$0xff] }
0x161f   :  { %2310 = vrot.lane.b32.xlu1 %v3758_v34, %s3390_s18 }
0x1623   :  { %2397 = vrot.lane.b32.xlu1 %v3836_v40, %s3391_s0 }
0x1627   :  { %2399 = vrot.lane.b32.xlu1 %v3834_v39, %s3391_s0 }
0x162b   :  { %2407 = vrot.lane.b32.xlu1 %v3180_v14, %s3392_s19  ;;  %v2885_v14 = vld [vmem:[%s3996_s7 + $0x70] sm:$0xff] }
0x162c   :  { %3208 = vmatprep.subr.mxu0 %v2885_v14 }
0x162d   :  { %3209 = vmatpush3.msra.mxu0 %v2885_v14 }
0x1697   :  { %v2291_v8 = vpop.xlane.xlu1 %2290 }
0x1698   :  { %v2293_v20 = vsub.f32 %v2285_v17, %v2291_v8  ;;  %v2882_v17 = vld [vmem:[%s3996_s7 + $0x58] sm:$0xff] }
0x1699   :  { %v2288_v3 = vpop.xlane.xlu0 %2287 }
0x169a   :  { %v2296_v10 = vmul.f32 1.442695, %v2293_v20  ;;  %v2292_v21 = vsub.f32 %v2284_v19, %v2288_v3  ;;  %v2879_v19 = vld [vmem:[%s3996_s7 + $0x40] sm:$0xff] }
0x169b   :  { %v2311_v31 = vpop.permute.xlu1 %2310 }
0x169c   :  { %3332 = vpow2.f32 %v2296_v10  ;;  %v2294_v30 = vmul.f32 1.442695, %v2292_v21  ;;  %3188 = vmatprep.subr.mxu1 %v2311_v31 }
0x169d   :  { %3189 = vmatpush3.msra.mxu1 %v2311_v31 }
0x169e   :  { %3334 = vpow2.f32 %v2294_v30 }
0x169f   :  { %v2398_v37 = vpop.permute.xlu1 %2397 }
0x16a0   :  { %v2419_v44 = vsel %vm152_vm3, %v3804_v6, %v2398_v37 }
0x16a3   :  { %v2400_v38 = vpop.permute.xlu1 %2399 }
0x16a4   :  { %v2420_v41 = vsel %vm152_vm3, %v3802_v5, %v2400_v38 }
0x16a7   :  { %v2408_v39 = vpop.permute.xlu1 %2407 }
0x16a8   :  { %v2422_v42 = vsel %vm68_vm0, %v2420_v41, %v2408_v39 }
0x16a9   :  { %v3333_v34 = vpop.eup %3332 }
0x16aa   :  { %v2301_v22 = vsel %vm68_vm0, %v3333_v34, 0.0 }
0x16ab   :  { %v3335_v23 = vpop.eup %3334  ;;  %2302 = vadd.xlane.f32.xlu0 %v2301_v22 }
0x16ac   :  { %v2298_v24 = vsel %vm68_vm0, %v3335_v23, 0.0 }
0x16af   :  { %2299 = vadd.xlane.f32.xlu0 %v2298_v24 }
0x16c5   :  { %2308 = vrot.lane.b32.xlu0 %v3760_v36, %s3390_s18 }
0x16c9   :  { %2405 = vrot.lane.b32.xlu0 %v2184_v15, %s3392_s19  ;;  %v2884_v15 = vld [vmem:[%s3996_s7 + $0x68] sm:$0xff] }
0x16ca   :  { %3210 = vmatprep.subr.mxu0 %v2884_v15 }
0x16cb   :  { %3211 = vmatpush3.msra.mxu0 %v2884_v15 }
0x16cc   :  { %3212 = vmatprep.subr.mxu0 %v2883_v11 }
0x16cd   :  { %3213 = vmatpush3.msra.mxu0 %v2883_v11 }
0x16ce   :  { %3214 = vmatprep.subr.mxu0 %v2882_v17 }
0x16cf   :  { %3215 = vmatpush3.msra.mxu0 %v2882_v17 }
0x16d0   :  { %3216 = vmatprep.subr.mxu0 %v2881_v16 }
0x16d1   :  { %3217 = vmatpush3.msra.mxu0 %v2881_v16 }
0x16d2   :  { %3218 = vmatprep.subr.mxu0 %v2880_v18 }
0x16d3   :  { %3219 = vmatpush3.msra.mxu0 %v2880_v18 }
0x16d4   :  { %3220 = vmatprep.subr.mxu0 %v2879_v19 }
0x16d5   :  { %3221 = vmatpush3.msra.mxu0 %v2879_v19 }
0x1734   :  { %v2303_v25 = vpop.xlane.xlu0 %2302 }
0x1735   :  { %3336 = vrcp.f32 %v2303_v25 }
0x1738   :  { %v2300_v26 = vpop.xlane.xlu0 %2299 }
0x1739   :  { %3338 = vrcp.f32 %v2300_v26 }
0x173c   :  { %v2309_v27 = vpop.permute.xlu0 %2308 }
0x173d   :  { %3190 = vmatprep.subr.mxu1 %v2309_v27 }
0x173e   :  { %3191 = vmatpush3.msra.mxu1 %v2309_v27 }
0x1740   :  { %v2406_v40 = vpop.permute.xlu0 %2405 }
0x1741   :  { %v2421_v46 = vsel %vm68_vm0, %v2419_v44, %v2406_v40 }
0x1742   :  { %v3337_v28 = vpop.eup %3336 }
0x1743   :  { %v2307_v33 = vmul.f32 %v3337_v28, %v3333_v34 }
0x1746   :  { %v3339_v29 = vpop.eup %3338 }
0x1747   :  { %v2305_v32 = vmul.f32 %v3339_v29, %v3335_v23 }
0x1749   :  { %3192 = vmatprep.mubr.msk.f32.mxu1 %vm68_vm0, %v2305_v32 }
0x174a   :  { %3193 = vmatmul.mubr.msk.f32.vlgmr.msra.gmra.mxu1 %vm68_vm0, %v2307_v33 }
0x180a   :  { %v3194_v35 = vpop.f32.mrf.mxu1 }
0x180b   :  { %2415 = vrot.lane.b32.xlu1 %v3194_v35, %s3393_s1  ;;  %v2887_v35 = vld [vmem:[%s3993_s4 + $0x9] ss:$0 sm:$0xff] }
0x180c   :  { %v2386_v36 = vpop.f32.mrf.mxu1 }
0x180d   :  { %2413 = vrot.lane.b32.xlu0 %v2386_v36, %s3393_s1 }
0x187d   :  { %v2416_v43 = vpop.permute.xlu1 %2415 }
0x187e   :  { %v2424_v45 = vsel %vm1236_vm15, %v2422_v42, %v2416_v43 }
0x187f   :  { %v3896_v47 = vadd.f32 %v2424_v45, %v3725_v9  ;;  %v2414_v48 = vpop.permute.xlu0 %2413  ;;  %v2873_v9 = vld [vmem:[%s3995_s6 + $0x38] sm:$0xff] }
0x1880   :  { %v2423_v49 = vsel %vm1236_vm15, %v2421_v46, %v2414_v48  ;;  %3195 = vmatprep.subr.mxu1 %v2873_v9  ;;  %v2686_v46 = vld [vmem:[%s3997_s8 + $0x18] sm:$0xff]  ;;  %v2685_v48 = vld [vmem:[%s3997_s8 + $0x10] sm:$0xff] }
0x1881   :  { %v3900_v50 = vadd.f32 %v2423_v49, %v3728_v13  ;;  %v2428_v5 = vmul.f32 %v3896_v47, %v3896_v47  ;;  %v2872_v13 = vld [vmem:[%s3995_s6 + $0x30] sm:$0xff]  ;;  %3196 = vmatpush3.msra.mxu1 %v2873_v9  ;;  %v2683_v49 = vld [vmem:[%s3997_s8] sm:$0xff] }
0x1882   :  { %3197 = vmatprep.subr.mxu1 %v2872_v13 }
0x1883   :  { %v2432_v51 = vsel %vm291_vm6, %v2428_v5, 0.0  ;;  %v2427_v6 = vmul.f32 %v3900_v50, %v3900_v50  ;;  %3198 = vmatpush3.msra.mxu1 %v2872_v13 }
0x1884   :  { %2433 = vadd.xlane.f32.xlu1 %v2432_v51  ;;  %3199 = vmatprep.subr.mxu1 %v2871_v55 }
0x1885   :  { %v2429_v52 = vsel %vm291_vm6, %v2427_v6, 0.0  ;;  %3200 = vmatpush3.msra.mxu1 %v2871_v55 }
0x1886   :  { %2430 = vadd.xlane.f32.xlu0 %v2429_v52  ;;  %3201 = vmatprep.subr.mxu1 %v2870_v53 }
0x1887   :  { %3202 = vmatpush3.msra.mxu1 %v2870_v53 }
0x1888   :  { %3225 = vmatprep.subr.mxu1 %v2686_v46 }
0x190d   :  { %v2434_v54 = vpop.xlane.xlu1 %2433 }
0x190e   :  { %v2436_v56 = vmul.f32 0.03125, %v2434_v54  ;;  %v2890_v54 = vld [vmem:[%s3993_s4 + $0xa] ss:$0 sm:$0xff] }
0x190f   :  { %v2431_v58 = vpop.xlane.xlu0 %2430 }
0x1910   :  { %v2438_v59 = vadd.f32 1e-06, %v2436_v56  ;;  %v2435_v60 = vmul.f32 0.03125, %v2431_v58 }
0x1912   :  { %3340 = vrsqrt.f32 %v2438_v59  ;;  %v2437_v61 = vadd.f32 1e-06, %v2435_v60  ;;  %v2891_v60 = vld [vmem:[%s3993_s4 + $0xb] ss:$0 sm:$0xff] }
0x1914   :  { %3342 = vrsqrt.f32 %v2437_v61 }
0x191f   :  { %v3341_v62 = vpop.eup %3340 }
0x1920   :  { %v2442_v0 = vmul.f32 %v3341_v62, %v3896_v47 }
0x1921   :  { %v3343_v63 = vpop.eup %3342 }
0x1922   :  { %v2441_v57 = vmul.f32 %v3343_v63, %v3900_v50  ;;  %v2448_v7 = vmul.f32 %v2869_v1, %v2442_v0 }
0x1924   :  { %v2447_v4 = vmul.f32 %v2869_v1, %v2441_v57 }
0x1926   :  { %3203 = vmatprep.mubr.msk.f32.mxu1 %vm291_vm6, %v2447_v4 }
0x1927   :  { %3204 = vmatmul.mubr.msk.f32.vlgmr.msra.gmra.mxu1 %vm291_vm6, %v2448_v7 }
0x1928   :  { %3226 = vmatpush3.msra.mxu1 %v2686_v46 }
0x1929   :  { %3227 = vmatprep.subr.mxu1 %v2685_v48 }
0x192a   :  { %3228 = vmatpush3.msra.mxu1 %v2685_v48 }
0x19e7   :  { %v3205_v8 = vpop.f32.mrf.mxu1 }
0x19e8   :  { %v2536_v20 = vadd.f32 %v3205_v8, %v2874_v2 }
0x19e9   :  { %v2530_v3 = vpop.f32.mrf.mxu1 }
0x19ea   :  { %v2531_v10 = vadd.f32 %v2874_v2, %v2530_v3  ;;  %2557 = vrot.lane.b32.xlu1 %v2536_v20, %s3383_s11  ;;  %v2878_v31 = vmul.f32 -1.442695, %v2536_v20 }
0x19ec   :  { %2555 = vrot.lane.b32.xlu0 %v2531_v10, %s3383_s11  ;;  %v2877_v21 = vmul.f32 -1.442695, %v2531_v10 }
0x19ee   :  { %3344 = vpow2.f32 %v2877_v21 }
0x19ef   :  { %3346 = vpow2.f32 %v2878_v31 }
0x19fb   :  { %v3345_v30 = vpop.eup %3344 }
0x19fc   :  { %v3347_v34 = vpop.eup %3346  ;;  %v2545_v22 = vadd.f32 1.0, %v3345_v30 }
0x19fd   :  { %v2546_v23 = vadd.f32 1.0, %v3347_v34 }
0x19fe   :  { %3348 = vrcp.f32 %v2545_v22 }
0x19ff   :  { %3350 = vrcp.f32 %v2546_v23 }
0x1a0b   :  { %v3349_v24 = vpop.eup %3348 }
0x1a0c   :  { %v3351_v25 = vpop.eup %3350  ;;  %v2551_v27 = vmul.f32 %v3349_v24, %v2531_v10 }
0x1a0d   :  { %v2552_v28 = vmul.f32 %v3351_v25, %v2536_v20 }
0x1a5c   :  { %v2558_v26 = vpop.permute.xlu1 %2557 }
0x1a5d   :  { %v2562_v33 = vmul.f32 %v2558_v26, %v2552_v28 }
0x1a5e   :  { %v2556_v29 = vpop.permute.xlu0 %2555 }
0x1a5f   :  { %v2561_v32 = vmul.f32 %v2556_v29, %v2551_v27 }
0x1a61   :  { %3222 = vmatprep.mubr.msk.f32.mxu0 %vm1388_vm1, %v2561_v32 }
0x1a62   :  { %3223 = vmatmul.mubr.msk.f32.vlgmr.msra.gmra.mxu0 %vm1388_vm1, %v2562_v33 }
0x1b22   :  { %v3224_v36 = vpop.f32.mrf.mxu0 }
0x1b23   :  { %v2654_v37 = vadd.f32 %v3224_v36, %v2887_v35 }
0x1b24   :  { %v2648_v38 = vpop.f32.mrf.mxu0 }
0x1b25   :  { %v2658_v39 = vadd.f32 %v2654_v37, %v3896_v47  ;;  %v2649_v40 = vadd.f32 %v2887_v35, %v2648_v38  ;;  %v2684_v47 = vld [vmem:[%s3997_s8 + $0x8] sm:$0xff] }
0x1b26   :  { %3229 = vmatprep.subr.mxu1 %v2684_v47 }
0x1b27   :  { %v2657_v41 = vadd.f32 %v2649_v40, %v3900_v50  ;;  %v2662_v42 = vmul.f32 %v2658_v39, %v2658_v39  ;;  %3230 = vmatpush3.msra.mxu1 %v2684_v47 }
0x1b28   :  { %3231 = vmatprep.subr.mxu1 %v2683_v49 }
0x1b29   :  { %v2666_v43 = vsel %vm291_vm6, %v2662_v42, 0.0  ;;  %v2661_v44 = vmul.f32 %v2657_v41, %v2657_v41  ;;  %3232 = vmatpush3.msra.mxu1 %v2683_v49 }
0x1b2a   :  { %2667 = vadd.xlane.f32.xlu1 %v2666_v43 }
0x1b2b   :  { %v2663_v45 = vsel %vm291_vm6, %v2661_v44, 0.0 }
0x1b2c   :  { %2664 = vadd.xlane.f32.xlu0 %v2663_v45 }
0x1bb3   :  { %v2668_v50 = vpop.xlane.xlu1 %2667 }
0x1bb4   :  { %v2670_v5 = vmul.f32 0.03125, %v2668_v50 }
0x1bb5   :  { %v2665_v51 = vpop.xlane.xlu0 %2664 }
0x1bb6   :  { %v2672_v6 = vadd.f32 1e-06, %v2670_v5  ;;  %v2669_v52 = vmul.f32 0.03125, %v2665_v51 }
0x1bb8   :  { %3352 = vrsqrt.f32 %v2672_v6  ;;  %v2671_v9 = vadd.f32 1e-06, %v2669_v52 }
0x1bba   :  { %3354 = vrsqrt.f32 %v2671_v9 }
0x1bc5   :  { %v3353_v13 = vpop.eup %3352 }
0x1bc6   :  { %v2676_v53 = vmul.f32 %v3353_v13, %v2658_v39 }
0x1bc7   :  { %v3355_v55 = vpop.eup %3354 }
0x1bc8   :  { %v2675_v56 = vmul.f32 %v3355_v55, %v2657_v41  ;;  %v2682_v59 = vmul.f32 %v2890_v54, %v2676_v53 }
0x1bca   :  { %v2681_v58 = vmul.f32 %v2890_v54, %v2675_v56 }
0x1bcc   :  { %3233 = vmatprep.mubr.msk.f32.mxu1 %vm291_vm6, %v2681_v58 }
0x1bcd   :  { %3234 = vmatmul.mubr.msk.f32.vlgmr.msra.gmra.mxu1 %vm291_vm6, %v2682_v59 }
0x1c8d   :  { %v3235_v61 = vpop.f32.mrf.mxu1 }
0x1c8e   :  { %v2769_v62 = vadd.f32 %v3235_v61, %v2891_v60 }
0x1c8f   :  { %v2763_v63 = vpop.f32.mrf.mxu1 }
0x1c90   :  { %2773 = vst [vmem:[#allocation2 + $0x8] sm:$0xff] %v2769_v62  ;;  %v2764_v0 = vadd.f32 %v2891_v60, %v2763_v63 }
0x1c92   :  { %2772 = vst [vmem:[#allocation2] sm:$0xff] %v2764_v0 }
0x1c93   :  { %3367 = shalt.err (!%p3364_p4)
}
0x1c94   :  { %s3395_s3 = smov 128  }
0x1c95   :  { %2785 = dma.vmem_to_hbm [thread:$0]  %s2780_s28, 256, %s3998_s9, [#allocation3], %s3395_s3, %s3395_s3, %s3391_s0  }
0x1c96   :  { %3376 = dma.done.wait [#allocation3], 256  }
0x1c97   :  { %3377 = vsyncadd [#allocation3], 4294967040 }
0x1c98   :  { %2789 = vsyncpa [#allocation3], 1 }

</bundles_post_ra>
